<compile_context>
chip_gen: v5e
topology: v5e:2x2
jax: 0.10.0
libtpu: 0.0.40
codegen_flags: <defaults>
</compile_context>

<pallas_src>
import functools

import jax
import jax.numpy as jnp
from jax.experimental import pallas as pl
from jax.experimental.pallas import tpu as pltpu

LANE = 128  # vreg lane width


def _round_up(x, m):
    return ((x + m - 1) // m) * m


def _choose_tk(last_dim, tk_max=2048):
    """K-tile (flattened-dim slab) size: full dim if small, else a bounded slab."""
    return min(_round_up(last_dim, LANE), tk_max)


def mlp_head_kernel(x_ref, w1_ref, b1_ref, w2_ref, b2_ref, w3_ref, b3_ref,
                    o_ref, h1_acc):
    """Grid = (batch_tile i, k_tile k).  h1 accumulates over k; finalize on last k."""
    k = pl.program_id(1)

    @pl.when(k == 0)
    def _():
        h1_acc[...] = jnp.zeros_like(h1_acc)

    # Stream a (tb, tk) bf16 x slab against a (tk, H1) bf16 W1 slab; f32 accumulation.
    h1_acc[...] += jnp.dot(x_ref[...], w1_ref[...],
                           preferred_element_type=jnp.float32)

    @pl.when(k == pl.num_programs(1) - 1)
    def _():
        # Dropout(0.2) layers are identity in eval/inference mode.
        h1 = jnp.maximum(h1_acc[...] + b1_ref[...], 0.0)          # ReLU after Linear1
        h2 = jnp.dot(h1.astype(jnp.bfloat16), w2_ref[...],
                     preferred_element_type=jnp.float32) + b2_ref[...]
        h2 = jnp.maximum(h2, 0.0)                                  # ReLU after Linear2
        o_ref[...] = (jnp.dot(h2.astype(jnp.bfloat16), w3_ref[...],
                              preferred_element_type=jnp.float32)
                      + b3_ref[...]).astype(o_ref.dtype)


def prepare_params(w1, b1, w2, b2, w3, b3, *, tk):
    """One-time parameter prep (hoisted out of the per-call path).

    Casts weights to bf16, zero-pads W1 rows up to a multiple of tk (so K-tiling over the
    flattened dim is exact), and lane-pads W3/b3 to a multiple of 128 (lane-dense output).
    """
    D, H1 = w1.shape
    H2 = w2.shape[1]
    n_out = w3.shape[1]
    Dp = _round_up(D, tk)
    Np = _round_up(n_out, LANE)

    w1_p = jnp.zeros((Dp, H1), jnp.bfloat16).at[:D, :].set(w1.astype(jnp.bfloat16))
    w2_b = w2.astype(jnp.bfloat16)
    w3_p = jnp.zeros((H2, Np), jnp.bfloat16).at[:, :n_out].set(w3.astype(jnp.bfloat16))
    b1_f = b1.astype(jnp.float32).reshape(1, H1)
    b2_f = b2.astype(jnp.float32).reshape(1, H2)
    b3_p = jnp.zeros((1, Np), jnp.float32).at[:, :n_out].set(
        b3.astype(jnp.float32).reshape(1, n_out))
    return w1_p, b1_f, w2_b, b2_f, w3_p, b3_p


@functools.partial(jax.jit, static_argnames=("n_out", "tb", "tk"))
def base_head_forward(x, w1_p, b1, w2, b2, w3_p, b3_p, *, n_out, tb=128, tk=2048):
    """x: (B, last_dim) bf16 (or f32) backbone features; params from prepare_params().

    Returns (B, n_outputs) f32 logits.
    """
    B, D = x.shape
    Dp, H1 = w1_p.shape
    H2 = w2.shape[1]
    Np = w3_p.shape[1]
    assert Dp % tk == 0

    # Backbone is expected to emit bf16 features; cast here only if it did not.
    if x.dtype != jnp.bfloat16:
        x = x.astype(jnp.bfloat16)
    if D != Dp:
        # Zero-pad the flattened dim so partial K blocks contribute exactly zero.
        x = jnp.pad(x, ((0, 0), (0, Dp - D)))

    # Clamp the batch tile to the batch (multiple of 16 => bf16 sublane-pack friendly).
    tb = max(16, min(tb, _round_up(B, 16)))
    nk = Dp // tk
    grid = (pl.cdiv(B, tb), nk)

    # Explicit scoped-VMEM budget from the actual footprint (with 2x headroom),
    # clamped to v7x physical VMEM per TensorCore.
    w1_bufs = 1 if nk == 1 else 2
    vmem_bytes = (
        2 * tb * tk * 2                   # x tile, double-buffered, bf16
        + w1_bufs * tk * H1 * 2           # W1 slab(s), bf16
        + (H1 * H2 + H2 * Np) * 2         # W2, W3 resident, single-buffered bf16
        + (H1 + H2 + Np) * 4              # biases, f32
        + 2 * tb * Np * 4                 # output tile, double-buffered f32
        + tb * H1 * 4                     # h1 accumulator scratch, f32
        + tb * max(H1, H2, Np) * 4        # live f32 intermediates
    )
    vmem_limit = int(min(64 * 1024 * 1024, max(4 * 1024 * 1024, 2 * vmem_bytes)))

    flops = 2 * B * (Dp * H1 + H1 * H2 + H2 * Np)
    bytes_accessed = (
        B * Dp * 2                                  # x (bf16 in)
        + (Dp * H1 + H1 * H2 + H2 * Np) * 2         # bf16 weights
        + (H1 + H2 + Np) * 4                        # f32 biases
        + B * Np * 4                                # f32 output
    )

    resident = pl.Buffered(1)  # constant index_map -> nothing to double-buffer
    w1_mode = pl.Buffered(1) if nk == 1 else None  # stream (double-buffer) only if tiled

    out = pl.pallas_call(
        mlp_head_kernel,
        out_shape=jax.ShapeDtypeStruct((B, Np), jnp.float32),
        grid_spec=pltpu.PrefetchScalarGridSpec(
            num_scalar_prefetch=0,
            grid=grid,
            in_specs=[
                pl.BlockSpec((tb, tk), lambda i, k: (i, k)),                        # x slab
                pl.BlockSpec((tk, H1), lambda i, k: (k, 0), pipeline_mode=w1_mode), # W1 slab
                pl.BlockSpec((1, H1), lambda i, k: (0, 0), pipeline_mode=resident), # b1
                pl.BlockSpec((H1, H2), lambda i, k: (0, 0), pipeline_mode=resident),# W2
                pl.BlockSpec((1, H2), lambda i, k: (0, 0), pipeline_mode=resident), # b2
                pl.BlockSpec((H2, Np), lambda i, k: (0, 0), pipeline_mode=resident),# W3 (padded)
                pl.BlockSpec((1, Np), lambda i, k: (0, 0), pipeline_mode=resident), # b3 (padded)
            ],
            out_specs=pl.BlockSpec((tb, Np), lambda i, k: (i, 0)),
            scratch_shapes=[pltpu.VMEM((tb, H1), jnp.float32)],  # h1 accumulator
        ),
        compiler_params=pltpu.CompilerParams(
            dimension_semantics=("parallel", "arbitrary"),
            vmem_limit_bytes=vmem_limit),
        cost_estimate=pl.CostEstimate(
            flops=flops, transcendentals=0, bytes_accessed=bytes_accessed),
    )(x, w1_p, b1, w2, b2, w3_p, b3_p)

    return out[:, :n_out]


def init_params(key, last_dim, n_outputs):
    """Deterministic synthetic f32 weights matching the nn.Linear shapes in Base.__init__.

    Weights stored as (in_features, out_features); biases (1, out_features).
    """
    k1, k2, k3, k4, k5, k6 = jax.random.split(key, 6)
    w1 = jax.random.normal(k1, (last_dim, 512), jnp.float32) * (1.0 / jnp.sqrt(last_dim))
    b1 = jax.random.normal(k2, (1, 512), jnp.float32) * 0.01
    w2 = jax.random.normal(k3, (512, 256), jnp.float32) * (1.0 / jnp.sqrt(512))
    b2 = jax.random.normal(k4, (1, 256), jnp.float32) * 0.01
    w3 = jax.random.normal(k5, (256, n_outputs), jnp.float32) * (1.0 / jnp.sqrt(256))
    b3 = jax.random.normal(k6, (1, n_outputs), jnp.float32) * 0.01
    return w1, b1, w2, b2, w3, b3


def reference_forward_f32(x, w1, b1, w2, b2, w3, b3):
    """Pure-f32 reference (module semantics)."""
    h1 = jnp.maximum(x @ w1 + b1, 0.0)
    h2 = jnp.maximum(h1 @ w2 + b2, 0.0)
    return h2 @ w3 + b3


def reference_forward_bf16(x_bf16, w1, b1, w2, b2, w3, b3):
    """Reference reproducing the kernel's bf16-operand / f32-accumulate numerics."""
    h1 = jnp.maximum(
        jnp.dot(x_bf16, w1.astype(jnp.bfloat16),
                preferred_element_type=jnp.float32) + b1, 0.0)
    h2 = jnp.maximum(
        jnp.dot(h1.astype(jnp.bfloat16), w2.astype(jnp.bfloat16),
                preferred_element_type=jnp.float32) + b2, 0.0)
    return jnp.dot(h2.astype(jnp.bfloat16), w3.astype(jnp.bfloat16),
                   preferred_element_type=jnp.float32) + b3


if __name__ == "__main__":
    key = jax.random.PRNGKey(0)
    kx, kp = jax.random.split(key)

    B = 2            # batch
    last_dim = 512   # flattened backbone feature dimension (e.g. resnet18 -> 512)
    n_outputs = 8    # number of classes

    x = jax.random.normal(kx, (B, last_dim), jnp.float32)
    raw_params = init_params(kp, last_dim, n_outputs)

    tk = _choose_tk(last_dim)
    params = prepare_params(*raw_params, tk=tk)       # one-time prep, outside the hot path
    x_bf16 = x.astype(jnp.bfloat16)                   # backbone emits bf16 features

    logits = base_head_forward(x_bf16, *params, n_out=n_outputs, tb=128, tk=tk)
    logits = jax.block_until_ready(logits)
    assert logits.shape == (B, n_outputs)

    # Tight check against a reference with identical bf16/f32 mixed-precision numerics.
    ref_bf16 = reference_forward_bf16(x_bf16, *raw_params)
    assert jnp.allclose(logits, ref_bf16, atol=5e-3, rtol=5e-3)

    # Sanity check against the full-f32 module semantics (looser: bf16 operand rounding).
    ref_f32 = reference_forward_f32(x, *raw_params)
    assert jnp.allclose(logits, ref_f32, atol=2e-1, rtol=2e-1)

    print("KERNEL_OK")
</pallas_src>

<mosaic_0001>
module attributes {stable_mosaic.version = 11 : i64} {
  func.func @mlp_head_kernel(%arg0: i32, %arg1: i32, %arg2: memref<16x512xbf16, #tpu.memory_space<vmem>>, %arg3: memref<512x512xbf16, #tpu.memory_space<vmem>>, %arg4: memref<1x512xf32, #tpu.memory_space<vmem>>, %arg5: memref<512x256xbf16, #tpu.memory_space<vmem>>, %arg6: memref<1x256xf32, #tpu.memory_space<vmem>>, %arg7: memref<256x128xbf16, #tpu.memory_space<vmem>>, %arg8: memref<1x128xf32, #tpu.memory_space<vmem>>, %arg9: memref<16x128xf32, #tpu.memory_space<vmem>>, %arg10: memref<16x512xf32, #tpu.memory_space<vmem>>) attributes {dimension_semantics = [#tpu.dimension_semantics<parallel>, #tpu.dimension_semantics<arbitrary>], iteration_bounds = array<i64: 1, 1>, scalar_prefetch = 0 : i64, scratch_operands = 1 : i64, tpu.core_type = #tpu.core_type<tc>, window_params = [{transform_indices = @transform_0, window_bounds = array<i64: 16, 512>}, {pipeline_mode = #tpu.pipeline_mode<synchronous>, transform_indices = @transform_1, window_bounds = array<i64: 512, 512>}, {pipeline_mode = #tpu.pipeline_mode<synchronous>, transform_indices = @transform_2, window_bounds = array<i64: 1, 512>}, {pipeline_mode = #tpu.pipeline_mode<synchronous>, transform_indices = @transform_3, window_bounds = array<i64: 512, 256>}, {pipeline_mode = #tpu.pipeline_mode<synchronous>, transform_indices = @transform_4, window_bounds = array<i64: 1, 256>}, {pipeline_mode = #tpu.pipeline_mode<synchronous>, transform_indices = @transform_5, window_bounds = array<i64: 256, 128>}, {pipeline_mode = #tpu.pipeline_mode<synchronous>, transform_indices = @transform_6, window_bounds = array<i64: 1, 128>}, {transform_indices = @transform_7, window_bounds = array<i64: 16, 128>}]} {
    %c0_i32 = arith.constant 0 : i32
    %0 = arith.cmpi eq, %arg1, %c0_i32 : i32
    %1 = arith.extui %0 : i1 to i32
    %c0_i32_0 = arith.constant 0 : i32
    %2 = arith.cmpi ne, %1, %c0_i32_0 : i32
    scf.if %2 {
      %cst_10 = arith.constant 0.000000e+00 : f32
      %12 = vector.broadcast %cst_10 : f32 to vector<16x512xf32>
      %c0_11 = arith.constant 0 : index
      %c0_12 = arith.constant 0 : index
      %13 = vector.load %arg10[%c0_11, %c0_12] : memref<16x512xf32, #tpu.memory_space<vmem>>, vector<16x512xf32>
      tpu.vector_store %arg10[%c0_11, %c0_12], %12 {strides = array<i32>} : memref<16x512xf32, #tpu.memory_space<vmem>>, vector<16x512xf32>,
    } else {
    }
    %c0 = arith.constant 0 : index
    %c0_1 = arith.constant 0 : index
    %3 = vector.load %arg10[%c0, %c0_1] : memref<16x512xf32, #tpu.memory_space<vmem>>, vector<16x512xf32>
    %c0_2 = arith.constant 0 : index
    %c0_3 = arith.constant 0 : index
    %4 = vector.load %arg2[%c0_2, %c0_3] : memref<16x512xbf16, #tpu.memory_space<vmem>>, vector<16x512xbf16>
    %c0_4 = arith.constant 0 : index
    %c0_5 = arith.constant 0 : index
    %5 = vector.load %arg3[%c0_4, %c0_5] : memref<512x512xbf16, #tpu.memory_space<vmem>>, vector<512x512xbf16>
    %cst = arith.constant dense<0.000000e+00> : vector<16x512xf32>
    %6 = tpu.matmul %4, %5, %cst {dimension_numbers = #tpu.dot_dimension_numbers<[1], [0], [0], [1], [0, 0, 1, 1], [], []>} : vector<16x512xbf16>, vector<512x512xbf16>, vector<16x512xf32> -> vector<16x512xf32>
    %7 = arith.addf %3, %6 : vector<16x512xf32>
    %c0_6 = arith.constant 0 : index
    %c0_7 = arith.constant 0 : index
    %8 = vector.load %arg10[%c0_6, %c0_7] : memref<16x512xf32, #tpu.memory_space<vmem>>, vector<16x512xf32>
    tpu.vector_store %arg10[%c0_6, %c0_7], %7 {strides = array<i32>} : memref<16x512xf32, #tpu.memory_space<vmem>>, vector<16x512xf32>,
    %c0_i32_8 = arith.constant 0 : i32
    %9 = arith.cmpi eq, %arg1, %c0_i32_8 : i32
    %10 = arith.extui %9 : i1 to i32
    %c0_i32_9 = arith.constant 0 : i32
    %11 = arith.cmpi ne, %10, %c0_i32_9 : i32
    scf.if %11 {
      %c0_10 = arith.constant 0 : index
      %c0_11 = arith.constant 0 : index
      %12 = vector.load %arg10[%c0_10, %c0_11] : memref<16x512xf32, #tpu.memory_space<vmem>>, vector<16x512xf32>
      %c0_12 = arith.constant 0 : index
      %c0_13 = arith.constant 0 : index
      %13 = vector.load %arg4[%c0_12, %c0_13] : memref<1x512xf32, #tpu.memory_space<vmem>>, vector<1x512xf32>
      %14 = vector.broadcast %13 : vector<1x512xf32> to vector<16x512xf32>
      %15 = arith.addf %12, %14 : vector<16x512xf32>
      %cst_14 = arith.constant 0.000000e+00 : f32
      %16 = vector.broadcast %cst_14 : f32 to vector<16x512xf32>
      %17 = arith.maximumf %15, %16 : vector<16x512xf32>
      %18 = arith.truncf %17 : vector<16x512xf32> to vector<16x512xbf16>
      %c0_15 = arith.constant 0 : index
      %c0_16 = arith.constant 0 : index
      %19 = vector.load %arg5[%c0_15, %c0_16] : memref<512x256xbf16, #tpu.memory_space<vmem>>, vector<512x256xbf16>
      %cst_17 = arith.constant dense<0.000000e+00> : vector<16x256xf32>
      %20 = tpu.matmul %18, %19, %cst_17 {dimension_numbers = #tpu.dot_dimension_numbers<[1], [0], [0], [1], [0, 0, 1, 1], [], []>} : vector<16x512xbf16>, vector<512x256xbf16>, vector<16x256xf32> -> vector<16x256xf32>
      %c0_18 = arith.constant 0 : index
      %c0_19 = arith.constant 0 : index
      %21 = vector.load %arg6[%c0_18, %c0_19] : memref<1x256xf32, #tpu.memory_space<vmem>>, vector<1x256xf32>
      %22 = vector.broadcast %21 : vector<1x256xf32> to vector<16x256xf32>
      %23 = arith.addf %20, %22 : vector<16x256xf32>
      %cst_20 = arith.constant 0.000000e+00 : f32
      %24 = vector.broadcast %cst_20 : f32 to vector<16x256xf32>
      %25 = arith.maximumf %23, %24 : vector<16x256xf32>
      %26 = arith.truncf %25 : vector<16x256xf32> to vector<16x256xbf16>
      %c0_21 = arith.constant 0 : index
      %c0_22 = arith.constant 0 : index
      %27 = vector.load %arg7[%c0_21, %c0_22] : memref<256x128xbf16, #tpu.memory_space<vmem>>, vector<256x128xbf16>
      %cst_23 = arith.constant dense<0.000000e+00> : vector<16x128xf32>
      %28 = tpu.matmul %26, %27, %cst_23 {dimension_numbers = #tpu.dot_dimension_numbers<[1], [0], [0], [1], [0, 0, 1, 1], [], []>} : vector<16x256xbf16>, vector<256x128xbf16>, vector<16x128xf32> -> vector<16x128xf32>
      %c0_24 = arith.constant 0 : index
      %c0_25 = arith.constant 0 : index
      %29 = vector.load %arg8[%c0_24, %c0_25] : memref<1x128xf32, #tpu.memory_space<vmem>>, vector<1x128xf32>
      %30 = vector.broadcast %29 : vector<1x128xf32> to vector<16x128xf32>
      %31 = arith.addf %28, %30 : vector<16x128xf32>
      %c0_26 = arith.constant 0 : index
      %c0_27 = arith.constant 0 : index
      %32 = vector.load %arg9[%c0_26, %c0_27] : memref<16x128xf32, #tpu.memory_space<vmem>>, vector<16x128xf32>
      tpu.vector_store %arg9[%c0_26, %c0_27], %31 {strides = array<i32>} : memref<16x128xf32, #tpu.memory_space<vmem>>, vector<16x128xf32>,
    } else {
    }
    return
  }
  func.func @transform_0(%arg0: i32, %arg1: i32) -> (i32, i32) {
    %c0_i32 = arith.constant 0 : i32
    return %arg0, %arg1 : i32, i32
  }
  func.func @transform_1(%arg0: i32, %arg1: i32) -> (i32, i32) {
    %c0_i32 = arith.constant 0 : i32
    %c0_i32_0 = arith.constant 0 : i32
    return %arg1, %c0_i32 : i32, i32
  }
  func.func @transform_2(%arg0: i32, %arg1: i32) -> (i32, i32) {
    %c0_i32 = arith.constant 0 : i32
    %c0_i32_0 = arith.constant 0 : i32
    %c0_i32_1 = arith.constant 0 : i32
    return %c0_i32, %c0_i32_0 : i32, i32
  }
  func.func @transform_3(%arg0: i32, %arg1: i32) -> (i32, i32) {
    %c0_i32 = arith.constant 0 : i32
    %c0_i32_0 = arith.constant 0 : i32
    %c0_i32_1 = arith.constant 0 : i32
    return %c0_i32, %c0_i32_0 : i32, i32
  }
  func.func @transform_4(%arg0: i32, %arg1: i32) -> (i32, i32) {
    %c0_i32 = arith.constant 0 : i32
    %c0_i32_0 = arith.constant 0 : i32
    %c0_i32_1 = arith.constant 0 : i32
    return %c0_i32, %c0_i32_0 : i32, i32
  }
  func.func @transform_5(%arg0: i32, %arg1: i32) -> (i32, i32) {
    %c0_i32 = arith.constant 0 : i32
    %c0_i32_0 = arith.constant 0 : i32
    %c0_i32_1 = arith.constant 0 : i32
    return %c0_i32, %c0_i32_0 : i32, i32
  }
  func.func @transform_6(%arg0: i32, %arg1: i32) -> (i32, i32) {
    %c0_i32 = arith.constant 0 : i32
    %c0_i32_0 = arith.constant 0 : i32
    %c0_i32_1 = arith.constant 0 : i32
    return %c0_i32, %c0_i32_0 : i32, i32
  }
  func.func @transform_7(%arg0: i32, %arg1: i32) -> (i32, i32) {
    %c0_i32 = arith.constant 0 : i32
    %c0_i32_0 = arith.constant 0 : i32
    return %arg0, %c0_i32 : i32, i32
  }
}

</mosaic_0001>

<bundles_post_ra>
// kernel: base_head_forward.1
= control target key start
LH: loop header
LB: loop body
LE: loop exit
PB: predicated region body
PF: predicated region fallthrough
CT: control target
= control target key end

     0   :  { %12 = vsyncpa [#allocation4], 0  ;;  %s3217_s0 = inlined_call_operand.hbm [shape: bf16[2,512], index: 0, kind: input, shape index: {}]   ;;  %s3218_s1 = inlined_call_operand.hbm [shape: bf16[512,512], index: 1, kind: input, shape index: {}]   ;;  %s3219_s2 = inlined_call_operand.hbm [shape: f32[1,512], index: 2, kind: input, shape index: {}]   ;;  %s3220_s3 = inlined_call_operand.hbm [shape: bf16[512,256], index: 3, kind: input, shape index: {}]   ;;  %s3221_s4 = inlined_call_operand.vmem [shape: f32[1,256], index: 4, kind: input, shape index: {}]   ;;  %s3222_s5 = inlined_call_operand.hbm [shape: bf16[256,128], index: 5, kind: input, shape index: {}]   ;;  %s3223_s6 = inlined_call_operand.vmem [shape: f32[1,128], index: 6, kind: input, shape index: {}]   ;;  %s3224_s7 = inlined_call_operand.hbm [shape: f32[2,128], index: 7, kind: output, shape index: {}]  }
   0x1   :  { %13 = vsyncpa [#allocation7], 0 }
   0x2   :  { %14 = vsyncpa [#allocation10], 0 }
   0x3   :  { %15 = vsyncpa [#allocation5], 0  ;;  %s33_s26 = sshll.u32 %s3218_s1, 4  ;;  %s34_s26 = int_to_ptr.hbm [resolvable:$true] %s33_s26 }
   0x4   :  { %19 = vsyncadd [#allocation4], 448  ;;  %s3109_s27 = smov [#allocation6]   ;;  %s57_s8 = sshll.u32 %s3220_s3, 4  ;;  %s58_s8 = int_to_ptr.hbm [resolvable:$true] %s57_s8 }
   0x5   :  { %s35_s28 = sshll.u32 %s3109_s27, 4  ;;  %s3110_s9 = smov 256   ;;  %s36_s28 = int_to_ptr.vmem [resolvable:$true] %s35_s28 }
   0x6   :  { %s3111_s10 = smov 16   ;;  %s3112_s11 = smov [#allocation9]  }
   0x7   :  { %41 = dma.hbm_to_vmem [thread:$0]  %s34_s26, 16384, %s36_s28, [#allocation7], %s3110_s9, %s3110_s9, %s3111_s10  }
   0x8   :  { %s59_s12 = sshll.u32 %s3112_s11, 4  ;;  %s3113_s13 = smov 128   ;;  %s60_s12 = int_to_ptr.vmem [resolvable:$true] %s59_s12 }
   0x9   :  { %s3114_s14 = smov 8   ;;  %s20_s16 = sshll.u32 %s3217_s0, 4  ;;  %s21_s16 = int_to_ptr.hbm [resolvable:$true] %s20_s16 }
   0xa   :  { %65 = dma.hbm_to_vmem [thread:$0]  %s58_s8, 8192, %s60_s12, [#allocation10], %s3113_s13, %s3113_s13, %s3114_s14  }
   0xb   :  { %s3115_s17 = smov [#allocation3]   ;;  %s47_s20 = sshll.u32 %s3219_s2, 4  ;;  %s48_s20 = int_to_ptr.hbm [resolvable:$true] %s47_s20 }
   0xc   :  { %s22_s18 = sshll.u32 %s3115_s17, 4  ;;  %s3116_s21 = smov 64   ;;  %s23_s18 = int_to_ptr.vmem [resolvable:$true] %s22_s18 }
   0xd   :  { %s3117_s22 = smov 4   ;;  %s3118_s23 = smov [#allocation8]  }
   0xe   :  { %28 = dma.hbm_to_vmem [thread:$0]  %s21_s16, 64, %s23_s18, [#allocation4], %s3116_s21, %s3116_s21, %s3117_s22  }
   0xf   :  { %s49_s24 = sshll.u32 %s3118_s23, 4  ;;  %s72_s27 = sshll.u32 %s3222_s5, 4  ;;  %s50_s24 = int_to_ptr.vmem [resolvable:$true] %s49_s24  ;;  %s73_s27 = int_to_ptr.hbm [resolvable:$true] %s72_s27 }
  0x10   :  { %52 = dma.hbm_to_vmem [thread:$0]  %s48_s20, 64, %s50_s24, [#allocation7]  }
  0x11   :  { %s3119_s0 = smov [#allocation11]  }
  0x12   :  { %s74_s28 = sshll.u32 %s3119_s0, 4  ;;  %s75_s28 = int_to_ptr.vmem [resolvable:$true] %s74_s28 }
  0x13   :  { %80 = dma.hbm_to_vmem [thread:$0]  %s73_s27, 2048, %s75_s28, [#allocation10], %s3116_s21, %s3116_s21, %s3117_s22  }
  0x14   :  { %3101 = dma.done.wait [#allocation4], 512  }
  0x15   :  { %3102 = vsyncadd [#allocation4], 4294966784 }
  0x16   :  { %3103 = dma.done.wait [#allocation7], 16448  }
  0x17   :  { %3104 = vsyncadd [#allocation7], 4294950848 }
  0x18   :  { %3105 = dma.done.wait [#allocation10], 10240  }
  0x19   :  { %3106 = vsyncadd [#allocation10], 4294957056  ;;  %v2016_v0 = vld [vmem:[#allocation6 + $0xe0] sm:$0xf]  ;;  %v2764_v1 = vld [vmem:[#allocation6 + $0xec] sm:$0xf0] }
  0x1a   :  { %v2144_v2 = vld [vmem:[#allocation6 + $0x1e0] sm:$0xf]  ;;  %v2017_v3 = vor.u32 %v2764_v1, %v2016_v0  ;;  %v2796_v4 = vld [vmem:[#allocation6 + $0x1ec] sm:$0xf0] }
  0x1b   :  { %v2272_v5 = vld [vmem:[#allocation6 + $0x2e0] sm:$0xf]  ;;  %v2828_v6 = vld [vmem:[#allocation6 + $0x2ec] sm:$0xf0]  ;;  %v2145_v7 = vor.u32 %v2796_v4, %v2144_v2 }
  0x1c   :  { %v2273_v8 = vor.u32 %v2828_v6, %v2272_v5  ;;  %v2400_v9 = vld [vmem:[#allocation6 + $0x3e0] sm:$0xf]  ;;  %v2860_v10 = vld [vmem:[#allocation6 + $0x3ec] sm:$0xf0]  ;;  %930 = vmatpush.bf16.msra.mxu0 %v2017_v3 }
  0x1d   :  { %v2000_v11 = vld [vmem:[#allocation6 + $0xc0] sm:$0xf]  ;;  %v2401_v12 = vor.u32 %v2860_v10, %v2400_v9  ;;  %v2760_v13 = vld [vmem:[#allocation6 + $0xcc] sm:$0xf0]  ;;  %944 = vmatpush.bf16.msra.mxu1 %v2145_v7 }
  0x1e   :  { %v2128_v14 = vld [vmem:[#allocation6 + $0x1c0] sm:$0xf]  ;;  %v2792_v15 = vld [vmem:[#allocation6 + $0x1cc] sm:$0xf0]  ;;  %958 = vmatpush.bf16.msra.mxu2 %v2273_v8  ;;  %v2001_v16 = vor.u32 %v2760_v13, %v2000_v11 }
  0x1f   :  { %v2129_v17 = vor.u32 %v2792_v15, %v2128_v14  ;;  %v2256_v18 = vld [vmem:[#allocation6 + $0x2c0] sm:$0xf]  ;;  %v2824_v19 = vld [vmem:[#allocation6 + $0x2cc] sm:$0xf0]  ;;  %972 = vmatpush.bf16.msra.mxu3 %v2401_v12 }
  0x20   :  { %v2384_v20 = vld [vmem:[#allocation6 + $0x3c0] sm:$0xf]  ;;  %v2257_v21 = vor.u32 %v2824_v19, %v2256_v18  ;;  %v2856_v22 = vld [vmem:[#allocation6 + $0x3cc] sm:$0xf0]  ;;  %931 = vmatpush.bf16.msra.mxu0 %v2001_v16 }
  0x21   :  { %v1984_v23 = vld [vmem:[#allocation6 + $0xa0] sm:$0xf]  ;;  %v2756_v24 = vld [vmem:[#allocation6 + $0xac] sm:$0xf0]  ;;  %v2385_v25 = vor.u32 %v2856_v22, %v2384_v20  ;;  %945 = vmatpush.bf16.msra.mxu1 %v2129_v17 }
  0x22   :  { %v2112_v26 = vld [vmem:[#allocation6 + $0x1a0] sm:$0xf]  ;;  %v2788_v27 = vld [vmem:[#allocation6 + $0x1ac] sm:$0xf0]  ;;  %v1985_v29 = vor.u32 %v2756_v24, %v1984_v23  ;;  %959 = vmatpush.bf16.msra.mxu2 %v2257_v21 }
  0x23   :  { %v2240_v28 = vld [vmem:[#allocation6 + $0x2a0] sm:$0xf]  ;;  %v2820_v30 = vld [vmem:[#allocation6 + $0x2ac] sm:$0xf0]  ;;  %v2113_v33 = vor.u32 %v2788_v27, %v2112_v26  ;;  %973 = vmatpush.bf16.msra.mxu3 %v2385_v25  ;;  %v2762_v27 = vld [vmem:[#allocation6 + $0xe4] sm:$0xf] }
  0x24   :  { %v2368_v31 = vld [vmem:[#allocation6 + $0x3a0] sm:$0xf]  ;;  %v2852_v32 = vld [vmem:[#allocation6 + $0x3ac] sm:$0xf0]  ;;  %v2241_v34 = vor.u32 %v2820_v30, %v2240_v28  ;;  %932 = vmatpush.bf16.msra.mxu0 %v1985_v29  ;;  %v2018_v28 = vld [vmem:[#allocation6 + $0xf0] sm:$0xf0] }
  0x25   :  { %v1968_v35 = vld [vmem:[#allocation6 + $0x80] sm:$0xf]  ;;  %v2752_v36 = vld [vmem:[#allocation6 + $0x8c] sm:$0xf0]  ;;  %v2369_v38 = vor.u32 %v2852_v32, %v2368_v31  ;;  %946 = vmatpush.bf16.msra.mxu1 %v2113_v33  ;;  %v124_v30 = vld [vmem:[#allocation3 + $0x4] sm:$0xf] }
  0x26   :  { %v2096_v37 = vld [vmem:[#allocation6 + $0x180] sm:$0xf]  ;;  %v2784_v39 = vld [vmem:[#allocation6 + $0x18c] sm:$0xf0]  ;;  %v1969_v44 = vor.u32 %v2752_v36, %v1968_v35  ;;  %960 = vmatpush.bf16.msra.mxu2 %v2241_v34  ;;  %v2794_v32 = vld [vmem:[#allocation6 + $0x1e4] sm:$0xf] }
  0x27   :  { %v2224_v40 = vld [vmem:[#allocation6 + $0x280] sm:$0xf]  ;;  %v2816_v41 = vld [vmem:[#allocation6 + $0x28c] sm:$0xf0]  ;;  %v2097_v45 = vor.u32 %v2784_v39, %v2096_v37  ;;  %974 = vmatpush.bf16.msra.mxu3 %v2369_v38  ;;  %v2146_v33 = vld [vmem:[#allocation6 + $0x1f0] sm:$0xf0] }
  0x28   :  { %v2352_v42 = vld [vmem:[#allocation6 + $0x380] sm:$0xf]  ;;  %v2848_v43 = vld [vmem:[#allocation6 + $0x38c] sm:$0xf0]  ;;  %v2225_v46 = vor.u32 %v2816_v41, %v2224_v40  ;;  %933 = vmatpush.bf16.msra.mxu0 %v1969_v44  ;;  %v2826_v34 = vld [vmem:[#allocation6 + $0x2e4] sm:$0xf] }
  0x29   :  { %v1952_v47 = vld [vmem:[#allocation6 + $0x60] sm:$0xf]  ;;  %v2748_v48 = vld [vmem:[#allocation6 + $0x6c] sm:$0xf0]  ;;  %v2353_v50 = vor.u32 %v2848_v43, %v2352_v42  ;;  %947 = vmatpush.bf16.msra.mxu1 %v2097_v45  ;;  %v2274_v35 = vld [vmem:[#allocation6 + $0x2f0] sm:$0xf0] }
  0x2a   :  { %v2080_v49 = vld [vmem:[#allocation6 + $0x160] sm:$0xf]  ;;  %v2780_v51 = vld [vmem:[#allocation6 + $0x16c] sm:$0xf0]  ;;  %v1953_v56 = vor.u32 %v2748_v48, %v1952_v47  ;;  %961 = vmatpush.bf16.msra.mxu2 %v2225_v46  ;;  %v125_v36 = vld [vmem:[#allocation3 + $0x8] sm:$0xf]  ;;  %v2021_v48 = vor.u32 %v2762_v27, %v2018_v28 }
  0x2b   :  { %v2208_v52 = vld [vmem:[#allocation6 + $0x260] sm:$0xf]  ;;  %v2812_v53 = vld [vmem:[#allocation6 + $0x26c] sm:$0xf0]  ;;  %v2081_v57 = vor.u32 %v2780_v51, %v2080_v49  ;;  %975 = vmatpush.bf16.msra.mxu3 %v2353_v50  ;;  %v2858_v37 = vld [vmem:[#allocation6 + $0x3e4] sm:$0xf]  ;;  %v2149_v51 = vor.u32 %v2794_v32, %v2146_v33 }
  0x2c   :  { %v2336_v54 = vld [vmem:[#allocation6 + $0x360] sm:$0xf]  ;;  %v2844_v55 = vld [vmem:[#allocation6 + $0x36c] sm:$0xf0]  ;;  %v2209_v58 = vor.u32 %v2812_v53, %v2208_v52  ;;  %934 = vmatpush.bf16.msra.mxu0 %v1953_v56  ;;  %v2402_v38 = vld [vmem:[#allocation6 + $0x3f0] sm:$0xf0]  ;;  %v2277_v52 = vor.u32 %v2826_v34, %v2274_v35 }
  0x2d   :  { %v1936_v59 = vld [vmem:[#allocation6 + $0x40] sm:$0xf]  ;;  %v2744_v60 = vld [vmem:[#allocation6 + $0x4c] sm:$0xf0]  ;;  %v2337_v62 = vor.u32 %v2844_v55, %v2336_v54  ;;  %948 = vmatpush.bf16.msra.mxu1 %v2081_v57  ;;  %v126_v39 = vld [vmem:[#allocation3 + $0xc] sm:$0xf]  ;;  %v2405_v55 = vor.u32 %v2858_v37, %v2402_v38 }
  0x2e   :  { %v2064_v61 = vld [vmem:[#allocation6 + $0x140] sm:$0xf]  ;;  %v2776_v63 = vld [vmem:[#allocation6 + $0x14c] sm:$0xf0]  ;;  %v1937_v4 = vor.u32 %v2744_v60, %v1936_v59  ;;  %962 = vmatpush.bf16.msra.mxu2 %v2209_v58  ;;  %v128_v42 = vld [vmem:[#allocation3 + $0x14] sm:$0xf] }
  0x2f   :  { %v2192_v0 = vld [vmem:[#allocation6 + $0x240] sm:$0xf]  ;;  %v2808_v1 = vld [vmem:[#allocation6 + $0x24c] sm:$0xf0]  ;;  %v2065_v6 = vor.u32 %v2776_v63, %v2064_v61  ;;  %976 = vmatpush.bf16.msra.mxu3 %v2337_v62  ;;  %263 = vst [vmem:[#allocation1 + $0x1] ss:$9 sm:$0xff] %v124_v30 }
  0x30   :  { %v2320_v2 = vld [vmem:[#allocation6 + $0x340] sm:$0xf]  ;;  %v2840_v3 = vld [vmem:[#allocation6 + $0x34c] sm:$0xf0]  ;;  %v2193_v7 = vor.u32 %v2808_v1, %v2192_v0  ;;  %935 = vmatpush.bf16.msra.mxu0 %v1937_v4  ;;  %v129_v45 = vld [vmem:[#allocation3 + $0x18] sm:$0xf] }
  0x31   :  { %v1920_v5 = vld [vmem:[#allocation6 + $0x20] sm:$0xf]  ;;  %v2740_v8 = vld [vmem:[#allocation6 + $0x2c] sm:$0xf0]  ;;  %v2321_v11 = vor.u32 %v2840_v3, %v2320_v2  ;;  %949 = vmatpush.bf16.msra.mxu1 %v2065_v6  ;;  %v130_v46 = vld [vmem:[#allocation3 + $0x1c] sm:$0xf] }
  0x32   :  { %v2048_v9 = vld [vmem:[#allocation6 + $0x120] sm:$0xf]  ;;  %v2772_v10 = vld [vmem:[#allocation6 + $0x12c] sm:$0xf0]  ;;  %v1921_v18 = vor.u32 %v2740_v8, %v1920_v5  ;;  %963 = vmatpush.bf16.msra.mxu2 %v2193_v7  ;;  %266 = vst [vmem:[#allocation1 + $0x2] ss:$9 sm:$0xff] %v125_v36 }
  0x33   :  { %v2176_v12 = vld [vmem:[#allocation6 + $0x220] sm:$0xf]  ;;  %v2804_v13 = vld [vmem:[#allocation6 + $0x22c] sm:$0xf0]  ;;  %v2049_v23 = vor.u32 %v2772_v10, %v2048_v9  ;;  %977 = vmatpush.bf16.msra.mxu3 %v2321_v11  ;;  %269 = vst [vmem:[#allocation1 + $0x3] ss:$9 sm:$0xff] %v126_v39 }
  0x34   :  { %v2304_v14 = vld [vmem:[#allocation6 + $0x320] sm:$0xf]  ;;  %v2836_v15 = vld [vmem:[#allocation6 + $0x32c] sm:$0xf0]  ;;  %v2177_v24 = vor.u32 %v2804_v13, %v2176_v12  ;;  %936 = vmatpush.bf16.msra.mxu0 %v1921_v18  ;;  %v2758_v49 = vld [vmem:[#allocation6 + $0xc4] sm:$0xf] }
  0x35   :  { %v1904_v16 = vld [vmem:[#allocation6] sm:$0xf]  ;;  %v2736_v17 = vld [vmem:[#allocation6 + $0xc] sm:$0xf0]  ;;  %v2305_v31 = vor.u32 %v2836_v15, %v2304_v14  ;;  %950 = vmatpush.bf16.msra.mxu1 %v2049_v23  ;;  %v2002_v50 = vld [vmem:[#allocation6 + $0xd0] sm:$0xf0] }
  0x36   :  { %v2032_v19 = vld [vmem:[#allocation6 + $0x100] sm:$0xf]  ;;  %v2768_v20 = vld [vmem:[#allocation6 + $0x10c] sm:$0xf0]  ;;  %v1905_v40 = vor.u32 %v2736_v17, %v1904_v16  ;;  %964 = vmatpush.bf16.msra.mxu2 %v2177_v24  ;;  %v2790_v53 = vld [vmem:[#allocation6 + $0x1c4] sm:$0xf]  ;;  %v2005_v60 = vor.u32 %v2758_v49, %v2002_v50 }
  0x37   :  { %v2160_v21 = vld [vmem:[#allocation6 + $0x200] sm:$0xf]  ;;  %v2800_v22 = vld [vmem:[#allocation6 + $0x20c] sm:$0xf0]  ;;  %v2033_v43 = vor.u32 %v2768_v20, %v2032_v19  ;;  %978 = vmatpush.bf16.msra.mxu3 %v2305_v31  ;;  %v2130_v54 = vld [vmem:[#allocation6 + $0x1d0] sm:$0xf0] }
  0x38   :  { %v2288_v25 = vld [vmem:[#allocation6 + $0x300] sm:$0xf]  ;;  %v2832_v26 = vld [vmem:[#allocation6 + $0x30c] sm:$0xf0]  ;;  %v2161_v44 = vor.u32 %v2800_v22, %v2160_v21  ;;  %937 = vmatpush.bf16.msra.mxu0 %v1905_v40  ;;  %275 = vst [vmem:[#allocation1 + $0x5] ss:$9 sm:$0xff] %v128_v42  ;;  %v2133_v61 = vor.u32 %v2790_v53, %v2130_v54 }
  0x39   :  { %v123_v29 = vld [vmem:[#allocation3] sm:$0xf]  ;;  %v127_v41 = vld [vmem:[#allocation3 + $0x10] sm:$0xf]  ;;  %v2289_v47 = vor.u32 %v2832_v26, %v2288_v25  ;;  %v2822_v56 = vld [vmem:[#allocation6 + $0x2c4] sm:$0xf]  ;;  %951 = vmatpush.bf16.msra.mxu1 %v2033_v43 }
  0x3a   :  { %260 = vst [vmem:[#allocation1] ss:$9 sm:$0xff] %v123_v29  ;;  %v2258_v57 = vld [vmem:[#allocation6 + $0x2d0] sm:$0xf0]  ;;  %965 = vmatpush.bf16.msra.mxu2 %v2161_v44  ;;  %v2854_v58 = vld [vmem:[#allocation6 + $0x3c4] sm:$0xf] }
  0x3b   :  { %272 = vst [vmem:[#allocation1 + $0x4] ss:$9 sm:$0xff] %v127_v41  ;;  %v2386_v59 = vld [vmem:[#allocation6 + $0x3d0] sm:$0xf0]  ;;  %979 = vmatpush.bf16.msra.mxu3 %v2289_v47  ;;  %v2261_v62 = vor.u32 %v2822_v56, %v2258_v57  ;;  %v2754_v0 = vld [vmem:[#allocation6 + $0xa4] sm:$0xf] }
  0x3c   :  { %278 = vst [vmem:[#allocation1 + $0x6] ss:$9 sm:$0xff] %v129_v45  ;;  %986 = vmatpush.bf16.msrb.mxu0 %v2021_v48  ;;  %v2389_v63 = vor.u32 %v2854_v58, %v2386_v59  ;;  %v1986_v1 = vld [vmem:[#allocation6 + $0xb0] sm:$0xf0]  ;;  %v2786_v2 = vld [vmem:[#allocation6 + $0x1a4] sm:$0xf] }
  0x3d   :  { %281 = vst [vmem:[#allocation1 + $0x7] ss:$9 sm:$0xff] %v130_v46  ;;  %1000 = vmatpush.bf16.msrb.mxu1 %v2149_v51  ;;  %v2114_v3 = vld [vmem:[#allocation6 + $0x1b0] sm:$0xf0]  ;;  %v2818_v4 = vld [vmem:[#allocation6 + $0x2a4] sm:$0xf]  ;;  %v1989_v11 = vor.u32 %v2754_v0, %v1986_v1 }
  0x3e   :  { %1014 = vmatpush.bf16.msrb.mxu2 %v2277_v52  ;;  %v2242_v5 = vld [vmem:[#allocation6 + $0x2b0] sm:$0xf0]  ;;  %v2850_v6 = vld [vmem:[#allocation6 + $0x3a4] sm:$0xf]  ;;  %v2117_v12 = vor.u32 %v2786_v2, %v2114_v3 }
  0x3f   :  { %1028 = vmatpush.bf16.msrb.mxu3 %v2405_v55  ;;  %v2370_v7 = vld [vmem:[#allocation6 + $0x3b0] sm:$0xf0]  ;;  %v2750_v8 = vld [vmem:[#allocation6 + $0x84] sm:$0xf]  ;;  %v2245_v19 = vor.u32 %v2818_v4, %v2242_v5 }
  0x40   :  { %987 = vmatpush.bf16.msrb.mxu0 %v2005_v60  ;;  %v1970_v9 = vld [vmem:[#allocation6 + $0x90] sm:$0xf0]  ;;  %v2782_v10 = vld [vmem:[#allocation6 + $0x184] sm:$0xf]  ;;  %v2373_v20 = vor.u32 %v2850_v6, %v2370_v7 }
  0x41   :  { %1001 = vmatpush.bf16.msrb.mxu1 %v2133_v61  ;;  %v2098_v13 = vld [vmem:[#allocation6 + $0x190] sm:$0xf0]  ;;  %v2814_v14 = vld [vmem:[#allocation6 + $0x284] sm:$0xf]  ;;  %v1973_v24 = vor.u32 %v2750_v8, %v1970_v9  ;;  %v2024_v8 = vld [vmem:[#allocation6 + $0xe8] sm:$0xf] }
  0x42   :  { %1015 = vmatpush.bf16.msrb.mxu2 %v2261_v62  ;;  %v2226_v15 = vld [vmem:[#allocation6 + $0x290] sm:$0xf0]  ;;  %v2846_v22 = vld [vmem:[#allocation6 + $0x384] sm:$0xf]  ;;  %v2101_v25 = vor.u32 %v2782_v10, %v2098_v13  ;;  %v2765_v9 = vld [vmem:[#allocation6 + $0xf4] sm:$0xf0] }
  0x43   :  { %1029 = vmatpush.bf16.msrb.mxu3 %v2389_v63  ;;  %v2354_v23 = vld [vmem:[#allocation6 + $0x390] sm:$0xf0]  ;;  %v2746_v26 = vld [vmem:[#allocation6 + $0x64] sm:$0xf]  ;;  %v2229_v28 = vor.u32 %v2814_v14, %v2226_v15  ;;  %v2152_v10 = vld [vmem:[#allocation6 + $0x1e8] sm:$0xf] }
  0x44   :  { %v3178_v16 = vld [vmem:[#allocation1 + $0x12] sm:$0xff]  ;;  %v3180_v17 = vld [vmem:[#allocation1 + $0x1b] sm:$0xff]  ;;  %v3186_v21 = vld [vmem:[#allocation1 + $0x9] sm:$0xff]  ;;  %988 = vmatpush.bf16.msrb.mxu0 %v1989_v11  ;;  %v2357_v29 = vor.u32 %v2846_v22, %v2354_v23 }
  0x45   :  { %v3182_v18 = vld [vmem:[#allocation1] sm:$0xff]  ;;  %966 = vmatmul.bf16.vlgmr.msra.gmra.mxu2 %v3178_v16  ;;  %980 = vmatmul.bf16.vlgmr.msra.gmra.mxu3 %v3180_v17  ;;  %v1954_v27 = vld [vmem:[#allocation6 + $0x70] sm:$0xf0]  ;;  %v2778_v30 = vld [vmem:[#allocation6 + $0x164] sm:$0xf] }
  0x46   :  { %938 = vmatmul.bf16.vlgmr.msra.gmra.mxu0 %v3182_v18  ;;  %952 = vmatmul.bf16.vlgmr.msra.gmra.mxu1 %v3186_v21  ;;  %v2082_v31 = vld [vmem:[#allocation6 + $0x170] sm:$0xf0]  ;;  %v2810_v32 = vld [vmem:[#allocation6 + $0x264] sm:$0xf]  ;;  %v1957_v36 = vor.u32 %v2746_v26, %v1954_v27  ;;  %v2797_v11 = vld [vmem:[#allocation6 + $0x1f4] sm:$0xf0] }
  0x47   :  { %1002 = vmatpush.bf16.msrb.mxu1 %v2117_v12  ;;  %1016 = vmatpush.bf16.msrb.mxu2 %v2245_v19  ;;  %v2210_v33 = vld [vmem:[#allocation6 + $0x270] sm:$0xf0]  ;;  %v2842_v34 = vld [vmem:[#allocation6 + $0x364] sm:$0xf]  ;;  %v2085_v37 = vor.u32 %v2778_v30, %v2082_v31  ;;  %v2280_v12 = vld [vmem:[#allocation6 + $0x2e8] sm:$0xf] }
  0x48   :  { %1030 = vmatpush.bf16.msrb.mxu3 %v2373_v20  ;;  %v2338_v35 = vld [vmem:[#allocation6 + $0x370] sm:$0xf0]  ;;  %989 = vmatpush.bf16.msrb.mxu0 %v1973_v24  ;;  %v2742_v38 = vld [vmem:[#allocation6 + $0x44] sm:$0xf]  ;;  %v2213_v40 = vor.u32 %v2810_v32, %v2210_v33  ;;  %v2829_v15 = vld [vmem:[#allocation6 + $0x2f4] sm:$0xf0]  ;;  %v2025_v24 = vor.u32 %v2765_v9, %v2024_v8 }
  0x49   :  { %v1938_v39 = vld [vmem:[#allocation6 + $0x50] sm:$0xf0]  ;;  %v2341_v41 = vor.u32 %v2842_v34, %v2338_v35  ;;  %v2774_v42 = vld [vmem:[#allocation6 + $0x144] sm:$0xf]  ;;  %v2408_v19 = vld [vmem:[#allocation6 + $0x3e8] sm:$0xf] }
  0x4a   :  { %v2066_v43 = vld [vmem:[#allocation6 + $0x150] sm:$0xf0]  ;;  %v2806_v44 = vld [vmem:[#allocation6 + $0x244] sm:$0xf]  ;;  %v1941_v48 = vor.u32 %v2742_v38, %v1938_v39  ;;  %v2861_v20 = vld [vmem:[#allocation6 + $0x3f4] sm:$0xf0] }
  0x4b   :  { %1003 = vmatpush.bf16.msrb.mxu1 %v2101_v25  ;;  %1017 = vmatpush.bf16.msrb.mxu2 %v2229_v28  ;;  %v2194_v45 = vld [vmem:[#allocation6 + $0x250] sm:$0xf0]  ;;  %v2838_v46 = vld [vmem:[#allocation6 + $0x344] sm:$0xf]  ;;  %v2069_v49 = vor.u32 %v2774_v42, %v2066_v43  ;;  %v2153_v25 = vor.u32 %v2797_v11, %v2152_v10  ;;  %v2008_v26 = vld [vmem:[#allocation6 + $0xc8] sm:$0xf]  ;;  %v2281_v28 = vor.u32 %v2829_v15, %v2280_v12 }
  0x4c   :  { %1031 = vmatpush.bf16.msrb.mxu3 %v2357_v29  ;;  %v2322_v47 = vld [vmem:[#allocation6 + $0x350] sm:$0xf0]  ;;  %990 = vmatpush.bf16.msrb.mxu0 %v1957_v36  ;;  %v2738_v50 = vld [vmem:[#allocation6 + $0x24] sm:$0xf]  ;;  %v2197_v52 = vor.u32 %v2806_v44, %v2194_v45  ;;  %v2761_v27 = vld [vmem:[#allocation6 + $0xd4] sm:$0xf0]  ;;  %v2409_v29 = vor.u32 %v2861_v20, %v2408_v19 }
  0x4d   :  { %v1922_v51 = vld [vmem:[#allocation6 + $0x30] sm:$0xf0]  ;;  %v2325_v53 = vor.u32 %v2838_v46, %v2322_v47  ;;  %v2770_v54 = vld [vmem:[#allocation6 + $0x124] sm:$0xf]  ;;  %v2136_v30 = vld [vmem:[#allocation6 + $0x1c8] sm:$0xf]  ;;  %v2009_v36 = vor.u32 %v2761_v27, %v2008_v26 }
  0x4e   :  { %v2050_v55 = vld [vmem:[#allocation6 + $0x130] sm:$0xf0]  ;;  %v2802_v56 = vld [vmem:[#allocation6 + $0x224] sm:$0xf]  ;;  %v1925_v61 = vor.u32 %v2738_v50, %v1922_v51  ;;  %v2793_v31 = vld [vmem:[#allocation6 + $0x1d4] sm:$0xf0] }
  0x4f   :  { %1004 = vmatpush.bf16.msrb.mxu1 %v2085_v37  ;;  %1018 = vmatpush.bf16.msrb.mxu2 %v2213_v40  ;;  %v2178_v57 = vld [vmem:[#allocation6 + $0x230] sm:$0xf0]  ;;  %v2834_v58 = vld [vmem:[#allocation6 + $0x324] sm:$0xf]  ;;  %v2053_v62 = vor.u32 %v2770_v54, %v2050_v55  ;;  %v2264_v32 = vld [vmem:[#allocation6 + $0x2c8] sm:$0xf]  ;;  %v2137_v37 = vor.u32 %v2793_v31, %v2136_v30 }
  0x50   :  { %1032 = vmatpush.bf16.msrb.mxu3 %v2341_v41  ;;  %v2306_v59 = vld [vmem:[#allocation6 + $0x330] sm:$0xf0]  ;;  %v2734_v60 = vld [vmem:[#allocation6 + $0x4] sm:$0xf]  ;;  %991 = vmatpush.bf16.msrb.mxu0 %v1941_v48  ;;  %v2181_v2 = vor.u32 %v2802_v56, %v2178_v57  ;;  %v2825_v33 = vld [vmem:[#allocation6 + $0x2d4] sm:$0xf0] }
  0x51   :  { %v1906_v63 = vld [vmem:[#allocation6 + $0x10] sm:$0xf0]  ;;  %v2766_v0 = vld [vmem:[#allocation6 + $0x104] sm:$0xf]  ;;  %v2309_v3 = vor.u32 %v2834_v58, %v2306_v59  ;;  %v2392_v34 = vld [vmem:[#allocation6 + $0x3c8] sm:$0xf]  ;;  %v2265_v40 = vor.u32 %v2825_v33, %v2264_v32 }
  0x52   :  { %v2034_v1 = vld [vmem:[#allocation6 + $0x110] sm:$0xf0]  ;;  %v2798_v4 = vld [vmem:[#allocation6 + $0x204] sm:$0xf]  ;;  %v1909_v13 = vor.u32 %v2734_v60, %v1906_v63  ;;  %v2857_v35 = vld [vmem:[#allocation6 + $0x3d4] sm:$0xf0] }
  0x53   :  { %1005 = vmatpush.bf16.msrb.mxu1 %v2069_v49  ;;  %1019 = vmatpush.bf16.msrb.mxu2 %v2197_v52  ;;  %v2162_v5 = vld [vmem:[#allocation6 + $0x210] sm:$0xf0]  ;;  %v2830_v6 = vld [vmem:[#allocation6 + $0x304] sm:$0xf]  ;;  %v2037_v14 = vor.u32 %v2766_v0, %v2034_v1  ;;  %v1992_v38 = vld [vmem:[#allocation6 + $0xa8] sm:$0xf]  ;;  %v2393_v41 = vor.u32 %v2857_v35, %v2392_v34 }
  0x54   :  { %1033 = vmatpush.bf16.msrb.mxu3 %v2325_v53  ;;  %v2290_v7 = vld [vmem:[#allocation6 + $0x310] sm:$0xf0]  ;;  %992 = vmatpush.bf16.msrb.mxu0 %v1925_v61  ;;  %v2165_v22 = vor.u32 %v2798_v4, %v2162_v5  ;;  %v2757_v39 = vld [vmem:[#allocation6 + $0xb4] sm:$0xf0]  ;;  %v2120_v42 = vld [vmem:[#allocation6 + $0x1a8] sm:$0xf] }
  0x55   :  { %v2293_v23 = vor.u32 %v2830_v6, %v2290_v7  ;;  %v2789_v43 = vld [vmem:[#allocation6 + $0x1b4] sm:$0xf0]  ;;  %v2248_v44 = vld [vmem:[#allocation6 + $0x2a8] sm:$0xf]  ;;  %v1993_v48 = vor.u32 %v2757_v39, %v1992_v38 }
  0x56   :  { %v2821_v45 = vld [vmem:[#allocation6 + $0x2b4] sm:$0xf0]  ;;  %v2376_v46 = vld [vmem:[#allocation6 + $0x3a8] sm:$0xf]  ;;  %v2121_v49 = vor.u32 %v2789_v43, %v2120_v42 }
  0x57   :  { %1006 = vmatpush.bf16.msrb.mxu1 %v2053_v62  ;;  %1020 = vmatpush.bf16.msrb.mxu2 %v2181_v2  ;;  %v2853_v47 = vld [vmem:[#allocation6 + $0x3b4] sm:$0xf0]  ;;  %v1976_v50 = vld [vmem:[#allocation6 + $0x88] sm:$0xf]  ;;  %v2249_v52 = vor.u32 %v2821_v45, %v2248_v44 }
  0x58   :  { %1034 = vmatpush.bf16.msrb.mxu3 %v2309_v3  ;;  %993 = vmatpush.bf16.msrb.mxu0 %v1909_v13  ;;  %v2753_v51 = vld [vmem:[#allocation6 + $0x94] sm:$0xf0]  ;;  %v2377_v53 = vor.u32 %v2853_v47, %v2376_v46  ;;  %v2104_v54 = vld [vmem:[#allocation6 + $0x188] sm:$0xf] }
  0x59   :  { %v2785_v55 = vld [vmem:[#allocation6 + $0x194] sm:$0xf0]  ;;  %v2232_v56 = vld [vmem:[#allocation6 + $0x288] sm:$0xf]  ;;  %v1977_v60 = vor.u32 %v2753_v51, %v1976_v50  ;;  %v2795_v50 = vld [vmem:[#allocation6 + $0x1ec] sm:$0xf] }
  0x5a   :  { %v2817_v57 = vld [vmem:[#allocation6 + $0x294] sm:$0xf0]  ;;  %v2360_v58 = vld [vmem:[#allocation6 + $0x388] sm:$0xf]  ;;  %v2105_v61 = vor.u32 %v2785_v55, %v2104_v54  ;;  %v2154_v51 = vld [vmem:[#allocation6 + $0x1f8] sm:$0xf0] }
  0x5b   :  { %1007 = vmatpush.bf16.msrb.mxu1 %v2037_v14  ;;  %1021 = vmatpush.bf16.msrb.mxu2 %v2165_v22  ;;  %v2849_v59 = vld [vmem:[#allocation6 + $0x394] sm:$0xf0]  ;;  %v1960_v62 = vld [vmem:[#allocation6 + $0x68] sm:$0xf]  ;;  %v2233_v0 = vor.u32 %v2817_v57, %v2232_v56  ;;  %v2282_v55 = vld [vmem:[#allocation6 + $0x2f8] sm:$0xf0] }
  0x5c   :  { %1035 = vmatpush.bf16.msrb.mxu3 %v2293_v23  ;;  %1042 = vmatpush.bf16.msra.mxu0 %v2025_v24  ;;  %v2749_v63 = vld [vmem:[#allocation6 + $0x74] sm:$0xf0]  ;;  %v2361_v1 = vor.u32 %v2849_v59, %v2360_v58  ;;  %v2088_v2 = vld [vmem:[#allocation6 + $0x168] sm:$0xf]  ;;  %v2859_v56 = vld [vmem:[#allocation6 + $0x3ec] sm:$0xf] }
  0x5d   :  { %994 = vmatmul.bf16.vlgmr.msrb.gmra.mxu0 %v3182_v18  ;;  %v2781_v3 = vld [vmem:[#allocation6 + $0x174] sm:$0xf0]  ;;  %v2216_v4 = vld [vmem:[#allocation6 + $0x268] sm:$0xf]  ;;  %v1961_v8 = vor.u32 %v2749_v63, %v1960_v62  ;;  %v2410_v57 = vld [vmem:[#allocation6 + $0x3f8] sm:$0xf0] }
  0x5e   :  { %1022 = vmatmul.bf16.vlgmr.msrb.gmra.mxu2 %v3178_v16  ;;  %1008 = vmatmul.bf16.vlgmr.msrb.gmra.mxu1 %v3186_v21  ;;  %v2813_v5 = vld [vmem:[#allocation6 + $0x274] sm:$0xf0]  ;;  %v2344_v6 = vld [vmem:[#allocation6 + $0x368] sm:$0xf]  ;;  %v2089_v9 = vor.u32 %v2781_v3, %v2088_v2  ;;  %v2759_v62 = vld [vmem:[#allocation6 + $0xcc] sm:$0xf]  ;;  %v2413_v2 = vor.u32 %v2859_v56, %v2410_v57 }
  0x5f   :  { %1056 = vmatpush.bf16.msra.mxu1 %v2153_v25  ;;  %1070 = vmatpush.bf16.msra.mxu2 %v2281_v28  ;;  %v2845_v7 = vld [vmem:[#allocation6 + $0x374] sm:$0xf0]  ;;  %v1944_v10 = vld [vmem:[#allocation6 + $0x48] sm:$0xf]  ;;  %v2217_v12 = vor.u32 %v2813_v5, %v2216_v4  ;;  %v2010_v63 = vld [vmem:[#allocation6 + $0xd8] sm:$0xf0] }
  0x60   :  { %1084 = vmatpush.bf16.msra.mxu3 %v2409_v29  ;;  %1043 = vmatpush.bf16.msra.mxu0 %v2009_v36  ;;  %v2745_v11 = vld [vmem:[#allocation6 + $0x54] sm:$0xf0]  ;;  %v2345_v13 = vor.u32 %v2845_v7, %v2344_v6  ;;  %v2072_v14 = vld [vmem:[#allocation6 + $0x148] sm:$0xf]  ;;  %v2138_v3 = vld [vmem:[#allocation6 + $0x1d8] sm:$0xf0] }
  0x61   :  { %1036 = vmatmul.bf16.vlgmr.msrb.gmra.mxu3 %v3180_v17  ;;  %v2777_v15 = vld [vmem:[#allocation6 + $0x154] sm:$0xf0]  ;;  %v2200_v19 = vld [vmem:[#allocation6 + $0x248] sm:$0xf]  ;;  %v1945_v24 = vor.u32 %v2745_v11, %v1944_v10  ;;  %v2823_v4 = vld [vmem:[#allocation6 + $0x2cc] sm:$0xf] }
  0x62   :  { %v2809_v20 = vld [vmem:[#allocation6 + $0x254] sm:$0xf0]  ;;  %v2328_v22 = vld [vmem:[#allocation6 + $0x348] sm:$0xf]  ;;  %v2073_v25 = vor.u32 %v2777_v15, %v2072_v14  ;;  %v2266_v5 = vld [vmem:[#allocation6 + $0x2d8] sm:$0xf0] }
  0x63   :  { %1057 = vmatpush.bf16.msra.mxu1 %v2137_v37  ;;  %1071 = vmatpush.bf16.msra.mxu2 %v2265_v40  ;;  %v2841_v23 = vld [vmem:[#allocation6 + $0x354] sm:$0xf0]  ;;  %v1928_v26 = vld [vmem:[#allocation6 + $0x28] sm:$0xf]  ;;  %v2201_v28 = vor.u32 %v2809_v20, %v2200_v19  ;;  %v2855_v6 = vld [vmem:[#allocation6 + $0x3cc] sm:$0xf] }
  0x64   :  { %1085 = vmatpush.bf16.msra.mxu3 %v2393_v41  ;;  %1044 = vmatpush.bf16.msra.mxu0 %v1993_v48  ;;  %v2741_v27 = vld [vmem:[#allocation6 + $0x34] sm:$0xf0]  ;;  %v2329_v29 = vor.u32 %v2841_v23, %v2328_v22  ;;  %v2056_v30 = vld [vmem:[#allocation6 + $0x128] sm:$0xf]  ;;  %v2763_v48 = vld [vmem:[#allocation6 + $0xec] sm:$0xf] }
  0x65   :  { %v2773_v31 = vld [vmem:[#allocation6 + $0x134] sm:$0xf0]  ;;  %v2184_v32 = vld [vmem:[#allocation6 + $0x228] sm:$0xf]  ;;  %v1929_v37 = vor.u32 %v2741_v27, %v1928_v26  ;;  %v2394_v7 = vld [vmem:[#allocation6 + $0x3d8] sm:$0xf0] }
  0x66   :  { %v2805_v33 = vld [vmem:[#allocation6 + $0x234] sm:$0xf0]  ;;  %v2312_v34 = vld [vmem:[#allocation6 + $0x328] sm:$0xf]  ;;  %v2057_v38 = vor.u32 %v2773_v31, %v2056_v30  ;;  %v2755_v10 = vld [vmem:[#allocation6 + $0xac] sm:$0xf] }
  0x67   :  { %1058 = vmatpush.bf16.msra.mxu1 %v2121_v49  ;;  %1072 = vmatpush.bf16.msra.mxu2 %v2249_v52  ;;  %v2837_v35 = vld [vmem:[#allocation6 + $0x334] sm:$0xf0]  ;;  %v1912_v36 = vld [vmem:[#allocation6 + $0x8] sm:$0xf]  ;;  %v2185_v42 = vor.u32 %v2805_v33, %v2184_v32  ;;  %v2026_v49 = vld [vmem:[#allocation6 + $0xf8] sm:$0xf0] }
  0x68   :  { %1086 = vmatpush.bf16.msra.mxu3 %v2377_v53  ;;  %1045 = vmatpush.bf16.msra.mxu0 %v1977_v60  ;;  %v2737_v39 = vld [vmem:[#allocation6 + $0x14] sm:$0xf0]  ;;  %v2040_v40 = vld [vmem:[#allocation6 + $0x108] sm:$0xf]  ;;  %v2313_v43 = vor.u32 %v2837_v35, %v2312_v34  ;;  %v2827_v52 = vld [vmem:[#allocation6 + $0x2ec] sm:$0xf]  ;;  %v2029_v60 = vor.u32 %v2763_v48, %v2026_v49 }
  0x69   :  { %v2769_v41 = vld [vmem:[#allocation6 + $0x114] sm:$0xf0]  ;;  %v2168_v44 = vld [vmem:[#allocation6 + $0x208] sm:$0xf]  ;;  %v1913_v53 = vor.u32 %v2737_v39, %v1912_v36  ;;  %v1994_v11 = vld [vmem:[#allocation6 + $0xb8] sm:$0xf0] }
  0x6a   :  { %v2801_v45 = vld [vmem:[#allocation6 + $0x214] sm:$0xf0]  ;;  %v2296_v46 = vld [vmem:[#allocation6 + $0x308] sm:$0xf]  ;;  %v2041_v54 = vor.u32 %v2769_v41, %v2040_v40  ;;  %v2787_v14 = vld [vmem:[#allocation6 + $0x1ac] sm:$0xf] }
  0x6b   :  { %1059 = vmatpush.bf16.msra.mxu1 %v2105_v61  ;;  %1073 = vmatpush.bf16.msra.mxu2 %v2233_v0  ;;  %v2833_v47 = vld [vmem:[#allocation6 + $0x314] sm:$0xf0]  ;;  %v2169_v58 = vor.u32 %v2801_v45, %v2168_v44  ;;  %v2157_v61 = vor.u32 %v2795_v50, %v2154_v51  ;;  %v2791_v0 = vld [vmem:[#allocation6 + $0x1cc] sm:$0xf]  ;;  %v2122_v15 = vld [vmem:[#allocation6 + $0x1b8] sm:$0xf0] }
  0x6c   :  { %1087 = vmatpush.bf16.msra.mxu3 %v2361_v1  ;;  %1046 = vmatpush.bf16.msra.mxu0 %v1961_v8  ;;  %v2297_v59 = vor.u32 %v2833_v47, %v2296_v46  ;;  %v2285_v1 = vor.u32 %v2827_v52, %v2282_v55  ;;  %v2013_v8 = vor.u32 %v2759_v62, %v2010_v63  ;;  %v2819_v19 = vld [vmem:[#allocation6 + $0x2ac] sm:$0xf]  ;;  %v2250_v20 = vld [vmem:[#allocation6 + $0x2b8] sm:$0xf0] }
  0x6d   :  { %v2851_v22 = vld [vmem:[#allocation6 + $0x3ac] sm:$0xf]  ;;  %v2378_v23 = vld [vmem:[#allocation6 + $0x3b8] sm:$0xf0] }
  0x6e   :  { %v2751_v26 = vld [vmem:[#allocation6 + $0x8c] sm:$0xf]  ;;  %v1978_v27 = vld [vmem:[#allocation6 + $0x98] sm:$0xf0] }
  0x6f   :  { %1060 = vmatpush.bf16.msra.mxu1 %v2089_v9  ;;  %1074 = vmatpush.bf16.msra.mxu2 %v2217_v12  ;;  %v2141_v9 = vor.u32 %v2791_v0, %v2138_v3  ;;  %v2269_v12 = vor.u32 %v2823_v4, %v2266_v5  ;;  %v2783_v30 = vld [vmem:[#allocation6 + $0x18c] sm:$0xf]  ;;  %v2106_v31 = vld [vmem:[#allocation6 + $0x198] sm:$0xf0]  ;;  %v1981_v36 = vor.u32 %v2751_v26, %v1978_v27 }
  0x70   :  { %1088 = vmatpush.bf16.msra.mxu3 %v2345_v13  ;;  %1047 = vmatpush.bf16.msra.mxu0 %v1945_v24  ;;  %v2397_v13 = vor.u32 %v2855_v6, %v2394_v7  ;;  %v1997_v24 = vor.u32 %v2755_v10, %v1994_v11  ;;  %v2815_v32 = vld [vmem:[#allocation6 + $0x28c] sm:$0xf]  ;;  %v2234_v33 = vld [vmem:[#allocation6 + $0x298] sm:$0xf0] }
  0x71   :  { %v2847_v34 = vld [vmem:[#allocation6 + $0x38c] sm:$0xf]  ;;  %v2362_v35 = vld [vmem:[#allocation6 + $0x398] sm:$0xf0]  ;;  %v2237_v40 = vor.u32 %v2815_v32, %v2234_v33 }
  0x72   :  { %v1962_v39 = vld [vmem:[#allocation6 + $0x78] sm:$0xf0]  ;;  %v2365_v41 = vor.u32 %v2847_v34, %v2362_v35  ;;  %v2811_v44 = vld [vmem:[#allocation6 + $0x26c] sm:$0xf]  ;;  %v2456_v34 = vld [vmem:[#allocation9 + $0x50] sm:$0xf] }
  0x73   :  { %1061 = vmatpush.bf16.msra.mxu1 %v2073_v25  ;;  %1075 = vmatpush.bf16.msra.mxu2 %v2201_v28  ;;  %v2125_v25 = vor.u32 %v2787_v14, %v2122_v15  ;;  %v2253_v28 = vor.u32 %v2819_v19, %v2250_v20  ;;  %v2218_v45 = vld [vmem:[#allocation6 + $0x278] sm:$0xf0]  ;;  %v2843_v46 = vld [vmem:[#allocation6 + $0x36c] sm:$0xf] }
  0x74   :  { %1089 = vmatpush.bf16.msra.mxu3 %v2329_v29  ;;  %1048 = vmatpush.bf16.msra.mxu0 %v1929_v37  ;;  %v2381_v29 = vor.u32 %v2851_v22, %v2378_v23  ;;  %v2109_v37 = vor.u32 %v2783_v30, %v2106_v31  ;;  %v2346_v47 = vld [vmem:[#allocation6 + $0x378] sm:$0xf0]  ;;  %v2743_v50 = vld [vmem:[#allocation6 + $0x4c] sm:$0xf]  ;;  %v2221_v52 = vor.u32 %v2811_v44, %v2218_v45  ;;  %v2464_v31 = vld [vmem:[#allocation9 + $0x60] sm:$0xf] }
  0x75   :  { %v1946_v51 = vld [vmem:[#allocation6 + $0x58] sm:$0xf0]  ;;  %v2807_v56 = vld [vmem:[#allocation6 + $0x24c] sm:$0xf]  ;;  %v2536_v44 = vld [vmem:[#allocation9 + $0xf0] sm:$0xf] }
  0x76   :  { %v2074_v55 = vld [vmem:[#allocation6 + $0x158] sm:$0xf0]  ;;  %v2739_v62 = vld [vmem:[#allocation6 + $0x2c] sm:$0xf] }
  0x77   :  { %1062 = vmatpush.bf16.msra.mxu1 %v2057_v38  ;;  %1076 = vmatpush.bf16.msra.mxu2 %v2185_v42  ;;  %v2747_v38 = vld [vmem:[#allocation6 + $0x6c] sm:$0xf]  ;;  %v2202_v57 = vld [vmem:[#allocation6 + $0x258] sm:$0xf0] }
  0x78   :  { %1090 = vmatpush.bf16.msra.mxu3 %v2313_v43  ;;  %1049 = vmatpush.bf16.msra.mxu0 %v1913_v53  ;;  %v2779_v42 = vld [vmem:[#allocation6 + $0x16c] sm:$0xf]  ;;  %v2090_v43 = vld [vmem:[#allocation6 + $0x178] sm:$0xf0]  ;;  %v1965_v48 = vor.u32 %v2747_v38, %v1962_v39  ;;  %v2349_v53 = vor.u32 %v2843_v46, %v2346_v47  ;;  %v2205_v0 = vor.u32 %v2807_v56, %v2202_v57  ;;  %v2424_v46 = vld [vmem:[#allocation9 + $0x10] sm:$0xf] }
  0x79   :  { %v2093_v49 = vor.u32 %v2779_v42, %v2090_v43  ;;  %v1930_v63 = vld [vmem:[#allocation6 + $0x38] sm:$0xf0]  ;;  %v2803_v4 = vld [vmem:[#allocation6 + $0x22c] sm:$0xf]  ;;  %v2432_v43 = vld [vmem:[#allocation9 + $0x20] sm:$0xf] }
  0x7a   :  { %v2058_v3 = vld [vmem:[#allocation6 + $0x138] sm:$0xf0]  ;;  %v2835_v6 = vld [vmem:[#allocation6 + $0x32c] sm:$0xf]  ;;  %v2520_v56 = vld [vmem:[#allocation9 + $0xd0] sm:$0xf] }
  0x7b   :  { %1063 = vmatpush.bf16.msra.mxu1 %v2041_v54  ;;  %1077 = vmatpush.bf16.msra.mxu2 %v2169_v58  ;;  %v2775_v54 = vld [vmem:[#allocation6 + $0x14c] sm:$0xf]  ;;  %v2186_v5 = vld [vmem:[#allocation6 + $0x238] sm:$0xf0] }
  0x7c   :  { %1091 = vmatpush.bf16.msra.mxu3 %v2297_v59  ;;  %1098 = vmatpush.bf16.msrb.mxu0 %v2029_v60  ;;  %v2839_v58 = vld [vmem:[#allocation6 + $0x34c] sm:$0xf]  ;;  %v2330_v59 = vld [vmem:[#allocation6 + $0x358] sm:$0xf0]  ;;  %v1949_v60 = vor.u32 %v2743_v50, %v1946_v51  ;;  %v2416_v50 = vld [vmem:[#allocation9] sm:$0xf] }
  0x7d   :  { %1050 = vmatmul.bf16.vlgmr.msra.gmra.mxu0 %v3182_v18  ;;  %v2314_v7 = vld [vmem:[#allocation6 + $0x338] sm:$0xf0]  ;;  %v2735_v10 = vld [vmem:[#allocation6 + $0xc] sm:$0xf] }
  0x7e   :  { %1078 = vmatmul.bf16.vlgmr.msra.gmra.mxu2 %v3178_v16  ;;  %1064 = vmatmul.bf16.vlgmr.msra.gmra.mxu1 %v3186_v21  ;;  %v1914_v11 = vld [vmem:[#allocation6 + $0x18] sm:$0xf0]  ;;  %v2767_v14 = vld [vmem:[#allocation6 + $0x10c] sm:$0xf] }
  0x7f   :  { %1112 = vmatpush.bf16.msrb.mxu1 %v2157_v61  ;;  %1126 = vmatpush.bf16.msrb.mxu2 %v2285_v1  ;;  %v2077_v61 = vor.u32 %v2775_v54, %v2074_v55  ;;  %v2333_v1 = vor.u32 %v2839_v58, %v2330_v59  ;;  %v2042_v15 = vld [vmem:[#allocation6 + $0x118] sm:$0xf0]  ;;  %v2799_v19 = vld [vmem:[#allocation6 + $0x20c] sm:$0xf]  ;;  %v1917_v26 = vor.u32 %v2735_v10, %v1914_v11  ;;  %v2474_v54 = vld [vmem:[#allocation9 + $0x78] sm:$0xf0] }
  0x80   :  { %1140 = vmatpush.bf16.msrb.mxu3 %v2413_v2  ;;  %1099 = vmatpush.bf16.msrb.mxu0 %v2013_v8  ;;  %v2771_v2 = vld [vmem:[#allocation6 + $0x12c] sm:$0xf]  ;;  %v1933_v8 = vor.u32 %v2739_v62, %v1930_v63  ;;  %v2170_v20 = vld [vmem:[#allocation6 + $0x218] sm:$0xf0]  ;;  %v2045_v27 = vor.u32 %v2767_v14, %v2042_v15  ;;  %v2512_v62 = vld [vmem:[#allocation9 + $0xc0] sm:$0xf] }
  0x81   :  { %1092 = vmatmul.bf16.vlgmr.msra.gmra.mxu3 %v3180_v17  ;;  %v2831_v22 = vld [vmem:[#allocation6 + $0x30c] sm:$0xf]  ;;  %v2298_v23 = vld [vmem:[#allocation6 + $0x318] sm:$0xf0]  ;;  %v2496_v10 = vld [vmem:[#allocation9 + $0xa0] sm:$0xf] }
  0x82   :  { %v2875_v32 = vld [vmem:[#allocation9 + $0x64] sm:$0xf0]  ;;  %v2873_v35 = vld [vmem:[#allocation9 + $0x54] sm:$0xf0]  ;;  %v2488_v14 = vld [vmem:[#allocation9 + $0x90] sm:$0xf] }
  0x83   :  { %1113 = vmatpush.bf16.msrb.mxu1 %v2141_v9  ;;  %1127 = vmatpush.bf16.msrb.mxu2 %v2269_v12  ;;  %v2061_v9 = vor.u32 %v2771_v2, %v2058_v3  ;;  %v2189_v12 = vor.u32 %v2803_v4, %v2186_v5  ;;  %v2465_v33 = vor.u32 %v2875_v32, %v2464_v31  ;;  %v2871_v38 = vld [vmem:[#allocation9 + $0x44] sm:$0xf0]  ;;  %v2893_v45 = vld [vmem:[#allocation9 + $0xf4] sm:$0xf0]  ;;  %v2872_v2 = vld [vmem:[#allocation9 + $0x54] sm:$0xf] }
  0x84   :  { %1141 = vmatpush.bf16.msrb.mxu3 %v2397_v13  ;;  %1100 = vmatpush.bf16.msrb.mxu0 %v1997_v24  ;;  %v2317_v13 = vor.u32 %v2835_v6, %v2314_v7  ;;  %v2472_v24 = vld [vmem:[#allocation9 + $0x70] sm:$0xf]  ;;  %v2537_v47 = vor.u32 %v2893_v45, %v2536_v44  ;;  %v2863_v51 = vld [vmem:[#allocation9 + $0x4] sm:$0xf0]  ;;  %v2889_v57 = vld [vmem:[#allocation9 + $0xd4] sm:$0xf0] }
  0x85   :  { %v2417_v55 = vor.u32 %v2863_v51, %v2416_v50  ;;  %v2521_v59 = vor.u32 %v2889_v57, %v2520_v56  ;;  %v2887_v63 = vld [vmem:[#allocation9 + $0xc4] sm:$0xf0]  ;;  %v2458_v3 = vld [vmem:[#allocation9 + $0x58] sm:$0xf0]  ;;  %v2504_v4 = vld [vmem:[#allocation9 + $0xb0] sm:$0xf] }
  0x86   :  { %v2885_v5 = vld [vmem:[#allocation9 + $0xb4] sm:$0xf0]  ;;  %v2461_v6 = vor.u32 %v2872_v2, %v2458_v3  ;;  %v2870_v7 = vld [vmem:[#allocation9 + $0x44] sm:$0xf]  ;;  %v2883_v11 = vld [vmem:[#allocation9 + $0xa4] sm:$0xf0] }
  0x87   :  { %1114 = vmatpush.bf16.msrb.mxu1 %v2125_v25  ;;  %1128 = vmatpush.bf16.msrb.mxu2 %v2253_v28  ;;  %v2877_v25 = vld [vmem:[#allocation9 + $0x74] sm:$0xf0]  ;;  %v2173_v28 = vor.u32 %v2799_v19, %v2170_v20  ;;  %v2868_v19 = vld [vmem:[#allocation9 + $0x34] sm:$0xf]  ;;  %v2442_v20 = vld [vmem:[#allocation9 + $0x38] sm:$0xf0] }
  0x88   :  { %1142 = vmatpush.bf16.msrb.mxu3 %v2381_v29  ;;  %1101 = vmatpush.bf16.msrb.mxu0 %v1981_v36  ;;  %v2301_v29 = vor.u32 %v2831_v22, %v2298_v23  ;;  %v2473_v30 = vor.u32 %v2877_v25, %v2472_v24  ;;  %v2457_v36 = vor.u32 %v2873_v35, %v2456_v34  ;;  %v2881_v15 = vld [vmem:[#allocation9 + $0x94] sm:$0xf0]  ;;  %v2864_v32 = vld [vmem:[#allocation9 + $0x14] sm:$0xf]  ;;  %v2600_v35 = vld [vmem:[#allocation9 + $0x170] sm:$0xf] }
  0x89   :  { %v2489_v22 = vor.u32 %v2881_v15, %v2488_v14  ;;  %v2445_v23 = vor.u32 %v2868_v19, %v2442_v20  ;;  %v2592_v44 = vld [vmem:[#allocation9 + $0x160] sm:$0xf]  ;;  %v2907_v45 = vld [vmem:[#allocation9 + $0x164] sm:$0xf0]  ;;  %v2530_v50 = vld [vmem:[#allocation9 + $0xe8] sm:$0xf0] }
  0x8a   :  { %v2584_v56 = vld [vmem:[#allocation9 + $0x150] sm:$0xf]  ;;  %v2905_v57 = vld [vmem:[#allocation9 + $0x154] sm:$0xf0]  ;;  %v2576_v2 = vld [vmem:[#allocation9 + $0x140] sm:$0xf] }
  0x8b   :  { %1115 = vmatpush.bf16.msrb.mxu1 %v2109_v37  ;;  %1129 = vmatpush.bf16.msrb.mxu2 %v2237_v40  ;;  %v2448_v37 = vld [vmem:[#allocation9 + $0x40] sm:$0xf]  ;;  %v2440_v40 = vld [vmem:[#allocation9 + $0x30] sm:$0xf]  ;;  %v2903_v3 = vld [vmem:[#allocation9 + $0x144] sm:$0xf0] }
  0x8c   :  { %1143 = vmatpush.bf16.msrb.mxu3 %v2365_v41  ;;  %1102 = vmatpush.bf16.msrb.mxu0 %v1965_v48  ;;  %v2449_v39 = vor.u32 %v2871_v38, %v2448_v37  ;;  %v2869_v41 = vld [vmem:[#allocation9 + $0x34] sm:$0xf0]  ;;  %v2528_v48 = vld [vmem:[#allocation9 + $0xe0] sm:$0xf]  ;;  %v2892_v37 = vld [vmem:[#allocation9 + $0xf4] sm:$0xf] }
  0x8d   :  { %v2441_v42 = vor.u32 %v2869_v41, %v2440_v40  ;;  %v2538_v38 = vld [vmem:[#allocation9 + $0xf8] sm:$0xf0] }
  0x8e   :  { %v2506_v15 = vld [vmem:[#allocation9 + $0xb8] sm:$0xf0] }
  0x8f   :  { %1116 = vmatpush.bf16.msrb.mxu1 %v2093_v49  ;;  %1130 = vmatpush.bf16.msrb.mxu2 %v2221_v52  ;;  %v2891_v49 = vld [vmem:[#allocation9 + $0xe4] sm:$0xf0] }
  0x90   :  { %1144 = vmatpush.bf16.msrb.mxu3 %v2349_v53  ;;  %1103 = vmatpush.bf16.msrb.mxu0 %v1949_v60  ;;  %v2529_v52 = vor.u32 %v2891_v49, %v2528_v48  ;;  %v2876_v53 = vld [vmem:[#allocation9 + $0x74] sm:$0xf]  ;;  %v2874_v60 = vld [vmem:[#allocation9 + $0x64] sm:$0xf]  ;;  %v2418_v48 = vld [vmem:[#allocation9 + $0x8] sm:$0xf0]  ;;  %v2593_v49 = vor.u32 %v2907_v45, %v2592_v44 }
  0x91   :  { %v2477_v58 = vor.u32 %v2876_v53, %v2474_v54  ;;  %v2482_v44 = vld [vmem:[#allocation9 + $0x88] sm:$0xf0]  ;;  %v2664_v45 = vld [vmem:[#allocation9 + $0x1f0] sm:$0xf] }
  0x93   :  { %1117 = vmatpush.bf16.msrb.mxu1 %v2077_v61  ;;  %1131 = vmatpush.bf16.msrb.mxu2 %v2205_v0  ;;  %v2466_v61 = vld [vmem:[#allocation9 + $0x68] sm:$0xf0] }
  0x94   :  { %1145 = vmatpush.bf16.msrb.mxu3 %v2333_v1  ;;  %1104 = vmatpush.bf16.msrb.mxu0 %v1933_v8  ;;  %v2469_v0 = vor.u32 %v2874_v60, %v2466_v61  ;;  %v2513_v1 = vor.u32 %v2887_v63, %v2512_v62  ;;  %v2505_v8 = vor.u32 %v2885_v5, %v2504_v4  ;;  %v2522_v60 = vld [vmem:[#allocation9 + $0xd8] sm:$0xf0]  ;;  %v2886_v4 = vld [vmem:[#allocation9 + $0xc4] sm:$0xf] }
  0x97   :  { %1118 = vmatpush.bf16.msrb.mxu1 %v2061_v9  ;;  %1132 = vmatpush.bf16.msrb.mxu2 %v2189_v12  ;;  %v2450_v9 = vld [vmem:[#allocation9 + $0x48] sm:$0xf0]  ;;  %v2497_v12 = vor.u32 %v2883_v11, %v2496_v10  ;;  %v2568_v11 = vld [vmem:[#allocation9 + $0x130] sm:$0xf] }
  0x98   :  { %1146 = vmatpush.bf16.msrb.mxu3 %v2317_v13  ;;  %1105 = vmatpush.bf16.msrb.mxu0 %v1917_v26  ;;  %v2453_v13 = vor.u32 %v2870_v7, %v2450_v9  ;;  %v2866_v26 = vld [vmem:[#allocation9 + $0x24] sm:$0xf]  ;;  %v2514_v7 = vld [vmem:[#allocation9 + $0xc8] sm:$0xf0] }
  0x99   :  { %v2517_v9 = vor.u32 %v2886_v4, %v2514_v7 }
  0x9b   :  { %1119 = vmatpush.bf16.msrb.mxu1 %v2045_v27  ;;  %1133 = vmatpush.bf16.msrb.mxu2 %v2173_v28  ;;  %v2434_v27 = vld [vmem:[#allocation9 + $0x28] sm:$0xf0] }
  0x9c   :  { %1147 = vmatpush.bf16.msrb.mxu3 %v2301_v29  ;;  %1601 = vmatpush.bf16.msra.mxu0 %v2473_v30  ;;  %v2480_v29 = vld [vmem:[#allocation9 + $0x80] sm:$0xf]  ;;  %v2879_v30 = vld [vmem:[#allocation9 + $0x84] sm:$0xf0]  ;;  %v2437_v31 = vor.u32 %v2866_v26, %v2434_v27 }
  0x9d   :  { %1106 = vmatmul.bf16.vlgmr.msrb.gmra.mxu0 %v3182_v18  ;;  %v2867_v18 = vld [vmem:[#allocation9 + $0x24] sm:$0xf0]  ;;  %v2481_v34 = vor.u32 %v2879_v30, %v2480_v29  ;;  %v2552_v29 = vld [vmem:[#allocation9 + $0x110] sm:$0xf]  ;;  %v2897_v30 = vld [vmem:[#allocation9 + $0x114] sm:$0xf0] }
  0x9e   :  { %1120 = vmatmul.bf16.vlgmr.msrb.gmra.mxu1 %v3186_v21  ;;  %1134 = vmatmul.bf16.vlgmr.msrb.gmra.mxu2 %v3178_v16  ;;  %v2433_v21 = vor.u32 %v2867_v18, %v2432_v43  ;;  %v2865_v16 = vld [vmem:[#allocation9 + $0x14] sm:$0xf0]  ;;  %v3202_v18 = vld [vmem:[#allocation8] sm:$0xf] }
  0x9f   :  { %1148 = vmatmul.bf16.vlgmr.msrb.gmra.mxu3 %v3180_v17  ;;  %1615 = vmatpush.bf16.msra.mxu1 %v2537_v47  ;;  %v2425_v17 = vor.u32 %v2865_v16, %v2424_v46  ;;  %v2890_v46 = vld [vmem:[#allocation9 + $0xe4] sm:$0xf] }
  0xa0   :  { %1602 = vmatpush.bf16.msra.mxu0 %v2465_v33  ;;  %v2426_v33 = vld [vmem:[#allocation9 + $0x18] sm:$0xf0]  ;;  %v2533_v53 = vor.u32 %v2890_v46, %v2530_v50 }
  0xa3   :  { %1616 = vmatpush.bf16.msra.mxu1 %v2529_v52  ;;  %v1183_v52 = vperm.slane %v3202_v18, 0 }
  0xa4   :  { %1603 = vmatpush.bf16.msra.mxu0 %v2457_v36  ;;  %v2909_v36 = vld [vmem:[#allocation9 + $0x174] sm:$0xf0] }
  0xa5   :  { %v2601_v41 = vor.u32 %v2909_v36, %v2600_v35  ;;  %v2553_v35 = vor.u32 %v2897_v30, %v2552_v29  ;;  %v2915_v29 = vld [vmem:[#allocation9 + $0x1a4] sm:$0xf0]  ;;  %v2898_v30 = vld [vmem:[#allocation9 + $0x124] sm:$0xf] }
  0xa7   :  { %1617 = vmatpush.bf16.msra.mxu1 %v2521_v59  ;;  %1629 = vmatpush.bf16.msra.mxu2 %v2601_v41  ;;  %v2585_v59 = vor.u32 %v2905_v57, %v2584_v56  ;;  %v2895_v41 = vld [vmem:[#allocation9 + $0x104] sm:$0xf0]  ;;  %v2906_v57 = vld [vmem:[#allocation9 + $0x164] sm:$0xf] }
  0xa8   :  { %1604 = vmatpush.bf16.msra.mxu0 %v2449_v39  ;;  %v2923_v56 = vld [vmem:[#allocation9 + $0x1e4] sm:$0xf0] }
  0xab   :  { %1618 = vmatpush.bf16.msra.mxu1 %v2513_v1  ;;  %1630 = vmatpush.bf16.msra.mxu2 %v2593_v49 }
  0xac   :  { %1605 = vmatpush.bf16.msra.mxu0 %v2441_v42  ;;  %v2541_v42 = vor.u32 %v2892_v37, %v2538_v38 }
  0xaf   :  { %1619 = vmatpush.bf16.msra.mxu1 %v2505_v8  ;;  %1631 = vmatpush.bf16.msra.mxu2 %v2585_v59  ;;  %v2594_v59 = vld [vmem:[#allocation9 + $0x168] sm:$0xf0] }
  0xb0   :  { %1606 = vmatpush.bf16.msra.mxu0 %v2433_v21  ;;  %v2429_v21 = vor.u32 %v2864_v32, %v2426_v33 }
  0xb3   :  { %1620 = vmatpush.bf16.msra.mxu1 %v2497_v12  ;;  %v2901_v12 = vld [vmem:[#allocation9 + $0x134] sm:$0xf0] }
  0xb4   :  { %1607 = vmatpush.bf16.msra.mxu0 %v2425_v17  ;;  %v2862_v17 = vld [vmem:[#allocation9 + $0x4] sm:$0xf]  ;;  %v2569_v14 = vor.u32 %v2901_v12, %v2568_v11  ;;  %v2919_v11 = vld [vmem:[#allocation9 + $0x1c4] sm:$0xf0] }
  0xb5   :  { %v2902_v12 = vld [vmem:[#allocation9 + $0x144] sm:$0xf] }
  0xb7   :  { %1621 = vmatpush.bf16.msra.mxu1 %v2489_v22  ;;  %v2560_v22 = vld [vmem:[#allocation9 + $0x120] sm:$0xf] }
  0xb8   :  { %1608 = vmatpush.bf16.msra.mxu0 %v2417_v55  ;;  %v2421_v55 = vor.u32 %v2862_v17, %v2418_v48  ;;  %v2602_v17 = vld [vmem:[#allocation9 + $0x178] sm:$0xf0] }
  0xbb   :  { %1622 = vmatpush.bf16.msra.mxu1 %v2481_v34  ;;  %v2490_v34 = vld [vmem:[#allocation9 + $0x98] sm:$0xf0] }
  0xbc   :  { %1657 = vmatpush.bf16.msrb.mxu0 %v2477_v58  ;;  %v2888_v58 = vld [vmem:[#allocation9 + $0xd4] sm:$0xf] }
  0xbf   :  { %1671 = vmatpush.bf16.msrb.mxu1 %v2541_v42  ;;  %v2878_v42 = vld [vmem:[#allocation9 + $0x84] sm:$0xf] }
  0xc0   :  { %1658 = vmatpush.bf16.msrb.mxu0 %v2469_v0  ;;  %v2525_v0 = vor.u32 %v2888_v58, %v2522_v60  ;;  %v2485_v46 = vor.u32 %v2878_v42, %v2482_v44  ;;  %v2597_v60 = vor.u32 %v2906_v57, %v2594_v59  ;;  %v2894_v44 = vld [vmem:[#allocation9 + $0x104] sm:$0xf]  ;;  %v1185_v57 = vperm.slane %v3202_v18, 2 }
  0xc3   :  { %v939_v24 = vpop.f32.mrf.mxu0  ;;  %v953_v25 = vpop.f32.mrf.mxu1  ;;  %1672 = vmatpush.bf16.msrb.mxu1 %v2533_v53  ;;  %v1184_v53 = vperm.slane %v3202_v18, 1 }
  0xc4   :  { %1659 = vmatpush.bf16.msrb.mxu0 %v2461_v6  ;;  %v954_v28 = vadd.f32 %v953_v25, %v939_v24  ;;  %v2577_v6 = vor.u32 %v2903_v3, %v2576_v2  ;;  %v2882_v24 = vld [vmem:[#allocation9 + $0xa4] sm:$0xf]  ;;  %v2498_v25 = vld [vmem:[#allocation9 + $0xa8] sm:$0xf0]  ;;  %v2921_v2 = vld [vmem:[#allocation9 + $0x1d4] sm:$0xf0] }
  0xc5   :  { %v2904_v3 = vld [vmem:[#allocation9 + $0x154] sm:$0xf] }
  0xc6   :  { %1632 = vmatpush.bf16.msra.mxu2 %v2577_v6 }
  0xc7   :  { %1673 = vmatpush.bf16.msrb.mxu1 %v2525_v0 }
  0xc8   :  { %1660 = vmatpush.bf16.msrb.mxu0 %v2453_v13  ;;  %v967_v39 = vpop.f32.mrf.mxu2  ;;  %v981_v40 = vpop.f32.mrf.mxu3  ;;  %v2884_v13 = vld [vmem:[#allocation9 + $0xb4] sm:$0xf] }
  0xc9   :  { %v968_v43 = vadd.f32 %v967_v39, %v954_v28  ;;  %v2509_v20 = vor.u32 %v2884_v13, %v2506_v15  ;;  %v2501_v28 = vor.u32 %v2882_v24, %v2498_v25  ;;  %v2900_v24 = vld [vmem:[#allocation9 + $0x134] sm:$0xf] }
  0xca   :  { %1633 = vmatpush.bf16.msra.mxu2 %v2569_v14  ;;  %v2578_v14 = vld [vmem:[#allocation9 + $0x148] sm:$0xf0] }
  0xcb   :  { %v941_v16 = vpop.f32.mrf.mxu0  ;;  %v955_v47 = vpop.f32.mrf.mxu1  ;;  %v982_v51 = vadd.f32 %v981_v40, %v968_v43  ;;  %1674 = vmatpush.bf16.msrb.mxu1 %v2517_v9  ;;  %v2544_v40 = vld [vmem:[#allocation9 + $0x100] sm:$0xf] }
  0xcc   :  { %1661 = vmatpush.bf16.msrb.mxu0 %v2445_v23  ;;  %v956_v54 = vadd.f32 %v955_v47, %v941_v16  ;;  %v2899_v23 = vld [vmem:[#allocation9 + $0x124] sm:$0xf0]  ;;  %v2925_v16 = vld [vmem:[#allocation9 + $0x1f4] sm:$0xf0]  ;;  %v2908_v47 = vld [vmem:[#allocation9 + $0x174] sm:$0xf] }
  0xcd   :  { %v1191_v61 = vadd.f32 %v1183_v52, %v982_v51  ;;  %v2561_v27 = vor.u32 %v2899_v23, %v2560_v22  ;;  %v2665_v50 = vor.u32 %v2925_v16, %v2664_v45  ;;  %v2605_v51 = vor.u32 %v2908_v47, %v2602_v17  ;;  %v2632_v22 = vld [vmem:[#allocation9 + $0x1b0] sm:$0xf]  ;;  %v2917_v23 = vld [vmem:[#allocation9 + $0x1b4] sm:$0xf0]  ;;  %v2546_v47 = vld [vmem:[#allocation9 + $0x108] sm:$0xf0] }
  0xce   :  { %v2633_v25 = vor.u32 %v2917_v23, %v2632_v22  ;;  %v2924_v17 = vld [vmem:[#allocation9 + $0x1f4] sm:$0xf]  ;;  %v2618_v22 = vld [vmem:[#allocation9 + $0x198] sm:$0xf0] }
  0xcf   :  { %v1199_v8 = vmax.f32 %v1191_v61, 0.0  ;;  %1675 = vmatpush.bf16.msrb.mxu1 %v2509_v20  ;;  %1634 = vmatpush.bf16.msra.mxu2 %v2561_v27 }
  0xd0   :  { %1662 = vmatpush.bf16.msrb.mxu0 %v2437_v31  ;;  %v969_v62 = vpop.f32.mrf.mxu2  ;;  %v983_v63 = vpop.f32.mrf.mxu3  ;;  %v2880_v31 = vld [vmem:[#allocation9 + $0x94] sm:$0xf]  ;;  %1643 = vmatpush.bf16.msra.mxu3 %v2665_v50  ;;  %v2549_v50 = vor.u32 %v2894_v44, %v2546_v47  ;;  %v2931_v47 = vld [vmem:[#allocation11 + $0x28] sm:$0xff] }
  0xd1   :  { %v970_v1 = vadd.f32 %v969_v62, %v956_v54  ;;  %v2493_v37 = vor.u32 %v2880_v31, %v2490_v34  ;;  %v2913_v34 = vld [vmem:[#allocation9 + $0x194] sm:$0xf0] }
  0xd3   :  { %v984_v5 = vadd.f32 %v983_v63, %v970_v1  ;;  %1676 = vmatpush.bf16.msrb.mxu1 %v2501_v28  ;;  %1635 = vmatpush.bf16.msra.mxu2 %v2553_v35  ;;  %v2648_v1 = vld [vmem:[#allocation9 + $0x1d0] sm:$0xf]  ;;  %v2624_v28 = vld [vmem:[#allocation9 + $0x1a0] sm:$0xf] }
  0xd4   :  { %1663 = vmatpush.bf16.msrb.mxu0 %v2429_v21  ;;  %v2545_v21 = vor.u32 %v2895_v41, %v2544_v40  ;;  %v2649_v4 = vor.u32 %v2921_v2, %v2648_v1  ;;  %v2625_v31 = vor.u32 %v2915_v29, %v2624_v28 }
  0xd5   :  { %v1195_v10 = vadd.f32 %v1183_v52, %v984_v5  ;;  %v2586_v5 = vld [vmem:[#allocation9 + $0x158] sm:$0xf0] }
  0xd6   :  { %v2589_v7 = vor.u32 %v2904_v3, %v2586_v5  ;;  %v2642_v5 = vld [vmem:[#allocation9 + $0x1c8] sm:$0xf0] }
  0xd7   :  { %v1203_v19 = vmax.f32 %v1195_v10, 0.0  ;;  %1677 = vmatpush.bf16.msrb.mxu1 %v2493_v37  ;;  %1636 = vmatpush.bf16.msra.mxu2 %v2545_v21  ;;  %v2640_v10 = vld [vmem:[#allocation9 + $0x1c0] sm:$0xf]  ;;  %v2554_v37 = vld [vmem:[#allocation9 + $0x118] sm:$0xf0] }
  0xd8   :  { %1664 = vmatpush.bf16.msrb.mxu0 %v2421_v55  ;;  %v2656_v55 = vld [vmem:[#allocation9 + $0x1e0] sm:$0xf]  ;;  %v2641_v13 = vor.u32 %v2919_v11, %v2640_v10  ;;  %v2911_v21 = vld [vmem:[#allocation9 + $0x184] sm:$0xf0]  ;;  %v2916_v10 = vld [vmem:[#allocation9 + $0x1b4] sm:$0xf] }
  0xd9   :  { %v1207_v26 = vpack.c.bf16 %v1203_v19, %v1199_v8  ;;  %v2657_v58 = vor.u32 %v2923_v56, %v2656_v55  ;;  %v2581_v19 = vor.u32 %v2902_v12, %v2578_v14  ;;  %v2658_v55 = vld [vmem:[#allocation9 + $0x1e8] sm:$0xf0]  ;;  %v2634_v11 = vld [vmem:[#allocation9 + $0x1b8] sm:$0xf0]  ;;  %v2914_v14 = vld [vmem:[#allocation9 + $0x1a4] sm:$0xf] }
  0xda   :  { %v995_v32 = vpop.f32.mrf.mxu0 }
  0xdb   :  { %1609 = vmatmul.bf16.vlgmr.msra.gmra.mxu0 %v1207_v26  ;;  %v1009_v33 = vpop.f32.mrf.mxu1  ;;  %1678 = vmatpush.bf16.msrb.mxu1 %v2485_v46 }
  0xdc   :  { %v1010_v36 = vadd.f32 %v1009_v33, %v995_v32  ;;  %1685 = vmatpush.bf16.msrb.mxu2 %v2605_v51  ;;  %1644 = vmatpush.bf16.msra.mxu3 %v2657_v58  ;;  %v2562_v32 = vld [vmem:[#allocation9 + $0x128] sm:$0xf0]  ;;  %v2616_v33 = vld [vmem:[#allocation9 + $0x190] sm:$0xf] }
  0xdd   :  { %v2565_v35 = vor.u32 %v2898_v30, %v2562_v32  ;;  %v2617_v40 = vor.u32 %v2913_v34, %v2616_v33 }
  0xe0   :  { %1686 = vmatpush.bf16.msrb.mxu2 %v2597_v60  ;;  %1645 = vmatpush.bf16.msra.mxu3 %v2649_v4  ;;  %v2918_v4 = vld [vmem:[#allocation9 + $0x1c4] sm:$0xf] }
  0xe1   :  { %v1023_v38 = vpop.f32.mrf.mxu2 }
  0xe2   :  { %v1024_v43 = vadd.f32 %v1023_v38, %v1010_v36  ;;  %v997_v48 = vpop.f32.mrf.mxu0  ;;  %v2896_v36 = vld [vmem:[#allocation9 + $0x114] sm:$0xf] }
  0xe3   :  { %v1011_v49 = vpop.f32.mrf.mxu1  ;;  %v2557_v41 = vor.u32 %v2896_v36, %v2554_v37  ;;  %v1186_v36 = vperm.slane %v3202_v18, 3  ;;  %v2929_v18 = vld [vmem:[#allocation11 + $0x18] sm:$0xff] }
  0xe4   :  { %v1037_v39 = vpop.f32.mrf.mxu3  ;;  %v1012_v54 = vadd.f32 %v1011_v49, %v997_v48  ;;  %1687 = vmatpush.bf16.msrb.mxu2 %v2589_v7  ;;  %1646 = vmatpush.bf16.msra.mxu3 %v2641_v13  ;;  %v2666_v48 = vld [vmem:[#allocation9 + $0x1f8] sm:$0xf0]  ;;  %v2637_v13 = vor.u32 %v2916_v10, %v2634_v11 }
  0xe5   :  { %v1038_v52 = vadd.f32 %v1037_v39, %v1024_v43  ;;  %v2608_v43 = vld [vmem:[#allocation9 + $0x180] sm:$0xf]  ;;  %v2669_v51 = vor.u32 %v2924_v17, %v2666_v48  ;;  %v2941_v48 = vld [vmem:[#allocation11 + $0x78] sm:$0xff] }
  0xe6   :  { %v2609_v16 = vor.u32 %v2911_v21, %v2608_v43  ;;  %v2930_v17 = vld [vmem:[#allocation11 + $0x20] sm:$0xff] }
  0xe7   :  { %v1192_v61 = vadd.f32 %v1184_v53, %v1038_v52 }
  0xe8   :  { %1688 = vmatpush.bf16.msrb.mxu2 %v2581_v19  ;;  %1647 = vmatpush.bf16.msra.mxu3 %v2633_v25 }
  0xe9   :  { %v1025_v62 = vpop.f32.mrf.mxu2  ;;  %v1200_v8 = vmax.f32 %v1192_v61, 0.0 }
  0xea   :  { %v1026_v0 = vadd.f32 %v1025_v62, %v1012_v54  ;;  %v2922_v54 = vld [vmem:[#allocation9 + $0x1e4] sm:$0xf]  ;;  %v2920_v62 = vld [vmem:[#allocation9 + $0x1d4] sm:$0xf] }
  0xeb   :  { %1665 = vmatmul.bf16.vlgmr.msrb.gmra.mxu0 %v1207_v26  ;;  %v2570_v26 = vld [vmem:[#allocation9 + $0x138] sm:$0xf0]  ;;  %v2661_v59 = vor.u32 %v2922_v54, %v2658_v55  ;;  %v2938_v54 = vld [vmem:[#allocation11 + $0x60] sm:$0xff] }
  0xec   :  { %v1039_v63 = vpop.f32.mrf.mxu3  ;;  %v2573_v27 = vor.u32 %v2900_v24, %v2570_v26  ;;  %1648 = vmatpush.bf16.msra.mxu3 %v2625_v31  ;;  %v2910_v26 = vld [vmem:[#allocation9 + $0x184] sm:$0xf]  ;;  %v2937_v55 = vld [vmem:[#allocation11 + $0x58] sm:$0xff] }
  0xed   :  { %v1040_v6 = vadd.f32 %v1039_v63, %v1026_v0  ;;  %v2650_v63 = vld [vmem:[#allocation9 + $0x1d8] sm:$0xf0] }
  0xee   :  { %1689 = vmatpush.bf16.msrb.mxu2 %v2573_v27  ;;  %v2653_v2 = vor.u32 %v2920_v62, %v2650_v63  ;;  %v2610_v27 = vld [vmem:[#allocation9 + $0x188] sm:$0xf0]  ;;  %v2934_v62 = vld [vmem:[#allocation11 + $0x40] sm:$0xff] }
  0xef   :  { %v1196_v9 = vadd.f32 %v1184_v53, %v1040_v6  ;;  %v2613_v28 = vor.u32 %v2910_v26, %v2610_v27 }
  0xf0   :  { %1649 = vmatpush.bf16.msra.mxu3 %v2617_v40 }
  0xf1   :  { %v1204_v15 = vmax.f32 %v1196_v9, 0.0 }
  0xf2   :  { %1690 = vmatpush.bf16.msrb.mxu2 %v2565_v35 }
  0xf3   :  { %v1208_v20 = vpack.c.bf16 %v1204_v15, %v1200_v8  ;;  %v2645_v8 = vor.u32 %v2918_v4, %v2642_v5  ;;  %v2626_v15 = vld [vmem:[#allocation9 + $0x1a8] sm:$0xf0] }
  0xf4   :  { %1650 = vmatpush.bf16.msra.mxu3 %v2609_v16  ;;  %v2629_v19 = vor.u32 %v2914_v14, %v2626_v15  ;;  %v2932_v16 = vld [vmem:[#allocation11 + $0x30] sm:$0xff] }
  0xf5   :  { %1623 = vmatmul.bf16.vlgmr.msra.gmra.mxu1 %v1208_v20 }
  0xf6   :  { %1691 = vmatpush.bf16.msrb.mxu2 %v2557_v41  ;;  %1865 = vmatpush.bf16.msra.mxu1 %v2941_v48 }
  0xf8   :  { %1699 = vmatpush.bf16.msrb.mxu3 %v2669_v51  ;;  %v2927_v51 = vld [vmem:[#allocation11 + $0x8] sm:$0xff] }
  0xfa   :  { %v1051_v38 = vpop.f32.mrf.mxu0  ;;  %1692 = vmatpush.bf16.msrb.mxu2 %v2549_v50  ;;  %v2940_v50 = vld [vmem:[#allocation11 + $0x70] sm:$0xff] }
  0xfb   :  { %v1065_v39 = vpop.f32.mrf.mxu1  ;;  %1866 = vmatpush.bf16.msra.mxu1 %v2940_v50 }
  0xfc   :  { %v1066_v42 = vadd.f32 %v1065_v39, %v1051_v38  ;;  %1700 = vmatpush.bf16.msrb.mxu3 %v2661_v59 }
 0x100   :  { %1701 = vmatpush.bf16.msrb.mxu3 %v2653_v2 }
 0x101   :  { %v1079_v45 = vpop.f32.mrf.mxu2 }
 0x102   :  { %v1080_v49 = vadd.f32 %v1079_v45, %v1066_v42  ;;  %v1053_v52 = vpop.f32.mrf.mxu0 }
 0x103   :  { %v1067_v53 = vpop.f32.mrf.mxu1 }
 0x104   :  { %v1093_v46 = vpop.f32.mrf.mxu3  ;;  %v1068_v58 = vadd.f32 %v1067_v53, %v1053_v52  ;;  %1702 = vmatpush.bf16.msrb.mxu3 %v2645_v8  ;;  %v2939_v52 = vld [vmem:[#allocation11 + $0x68] sm:$0xff]  ;;  %v2926_v53 = vld [vmem:[#allocation11] sm:$0xff] }
 0x105   :  { %v1094_v56 = vadd.f32 %v1093_v46, %v1080_v49  ;;  %1679 = vmatmul.bf16.vlgmr.msrb.gmra.mxu1 %v1208_v20  ;;  %v2912_v20 = vld [vmem:[#allocation9 + $0x194] sm:$0xf]  ;;  %v2933_v46 = vld [vmem:[#allocation11 + $0x38] sm:$0xff] }
 0x106   :  { %v2621_v25 = vor.u32 %v2912_v20, %v2618_v22  ;;  %1851 = vmatpush.bf16.msra.mxu0 %v2933_v46  ;;  %v2928_v49 = vld [vmem:[#allocation11 + $0x10] sm:$0xff]  ;;  %1867 = vmatpush.bf16.msra.mxu1 %v2939_v52 }
 0x107   :  { %v1193_v0 = vadd.f32 %v1185_v57, %v1094_v56 }
 0x108   :  { %1703 = vmatpush.bf16.msrb.mxu3 %v2637_v13 }
 0x109   :  { %v1081_v60 = vpop.f32.mrf.mxu2  ;;  %v1201_v6 = vmax.f32 %v1193_v0, 0.0 }
 0x10a   :  { %v1082_v1 = vadd.f32 %v1081_v60, %v1068_v58  ;;  %1852 = vmatpush.bf16.msra.mxu0 %v2932_v16  ;;  %1868 = vmatpush.bf16.msra.mxu1 %v2938_v54  ;;  %v2935_v60 = vld [vmem:[#allocation11 + $0x48] sm:$0xff] }
 0x10c   :  { %v1095_v61 = vpop.f32.mrf.mxu3  ;;  %1704 = vmatpush.bf16.msrb.mxu3 %v2629_v19 }
 0x10d   :  { %v1096_v3 = vadd.f32 %v1095_v61, %v1082_v1  ;;  %v1275_v61 = vld [vmem:[%s3221_s4] sm:$0x3] }
 0x10e   :  { %1853 = vmatpush.bf16.msra.mxu0 %v2931_v47  ;;  %1869 = vmatpush.bf16.msra.mxu1 %v2937_v55  ;;  %v1277_v0 = vperm.slane %v1275_v61, 0  ;;  %v1278_v22 = vperm.slane %v1275_v61, 1 }
 0x10f   :  { %v1197_v7 = vadd.f32 %v1185_v57, %v1096_v3  ;;  %v2936_v57 = vld [vmem:[#allocation11 + $0x50] sm:$0xff] }
 0x110   :  { %1705 = vmatpush.bf16.msrb.mxu3 %v2621_v25 }
 0x111   :  { %v1205_v9 = vmax.f32 %v1197_v7, 0.0 }
 0x112   :  { %1854 = vmatpush.bf16.msra.mxu0 %v2930_v17  ;;  %1870 = vmatpush.bf16.msra.mxu1 %v2936_v57 }
 0x113   :  { %v1209_v12 = vpack.c.bf16 %v1205_v9, %v1201_v6 }
 0x114   :  { %1706 = vmatpush.bf16.msrb.mxu3 %v2613_v28 }
 0x115   :  { %1637 = vmatmul.bf16.vlgmr.msra.gmra.mxu2 %v1209_v12 }
 0x116   :  { %1855 = vmatpush.bf16.msra.mxu0 %v2929_v18  ;;  %1871 = vmatpush.bf16.msra.mxu1 %v2935_v60 }
 0x11a   :  { %v1107_v23 = vpop.f32.mrf.mxu0  ;;  %1856 = vmatpush.bf16.msra.mxu0 %v2928_v49  ;;  %1872 = vmatpush.bf16.msra.mxu1 %v2934_v62 }
 0x11b   :  { %v1121_v24 = vpop.f32.mrf.mxu1 }
 0x11c   :  { %v1122_v29 = vadd.f32 %v1121_v24, %v1107_v23 }
 0x11e   :  { %1857 = vmatpush.bf16.msra.mxu0 %v2927_v51 }
 0x121   :  { %v1135_v30 = vpop.f32.mrf.mxu2 }
 0x122   :  { %v1149_v31 = vpop.f32.mrf.mxu3  ;;  %v1136_v32 = vadd.f32 %v1135_v30, %v1122_v29  ;;  %v1109_v33 = vpop.f32.mrf.mxu0  ;;  %1858 = vmatpush.bf16.msra.mxu0 %v2926_v53 }
 0x123   :  { %v1123_v34 = vpop.f32.mrf.mxu1 }
 0x124   :  { %v1150_v35 = vadd.f32 %v1149_v31, %v1136_v32  ;;  %v1124_v37 = vadd.f32 %v1123_v34, %v1109_v33 }
 0x125   :  { %1693 = vmatmul.bf16.vlgmr.msrb.gmra.mxu2 %v1209_v12 }
 0x126   :  { %v1194_v41 = vadd.f32 %v1186_v36, %v1150_v35 }
 0x128   :  { %v1202_v21 = vmax.f32 %v1194_v41, 0.0  ;;  %v2956_v41 = vld [vmem:[%s3223_s6] ss:$0 sm:$0xff] }
 0x129   :  { %v1137_v38 = vpop.f32.mrf.mxu2 }
 0x12a   :  { %v1138_v39 = vadd.f32 %v1137_v38, %v1124_v37  ;;  %v1151_v40 = vpop.f32.mrf.mxu3 }
 0x12c   :  { %v1152_v42 = vadd.f32 %v1151_v40, %v1138_v39 }
 0x12e   :  { %v1198_v43 = vadd.f32 %v1186_v36, %v1152_v42 }
 0x130   :  { %v1206_v44 = vmax.f32 %v1198_v43, 0.0 }
 0x132   :  { %v1210_v45 = vpack.c.bf16 %v1206_v44, %v1202_v21 }
 0x134   :  { %1651 = vmatmul.bf16.vlgmr.msra.gmra.mxu3 %v1210_v45 }
 0x144   :  { %1707 = vmatmul.bf16.vlgmr.msrb.gmra.mxu3 %v1210_v45 }
 0x158   :  { %v1610_v56 = vpop.f32.mrf.mxu0 }
 0x159   :  { %v1611_v4 = vadd.f32 %v1610_v56, %v1277_v0 }
 0x160   :  { %v1612_v63 = vpop.f32.mrf.mxu0 }
 0x161   :  { %v1613_v5 = vadd.f32 %v1612_v63, %v1277_v0 }
 0x168   :  { %v1666_v9 = vpop.f32.mrf.mxu0 }
 0x169   :  { %v1667_v26 = vadd.f32 %v1666_v9, %v1278_v22 }
 0x170   :  { %v1668_v24 = vpop.f32.mrf.mxu0 }
 0x171   :  { %v1669_v28 = vadd.f32 %v1668_v24, %v1278_v22 }
 0x172   :  { %v1624_v58 = vpop.f32.mrf.mxu1 }
 0x173   :  { %v1625_v6 = vadd.f32 %v1624_v58, %v1611_v4 }
 0x17a   :  { %v1626_v1 = vpop.f32.mrf.mxu1 }
 0x17b   :  { %v1627_v7 = vadd.f32 %v1626_v1, %v1613_v5 }
 0x182   :  { %v1680_v12 = vpop.f32.mrf.mxu1 }
 0x183   :  { %v1681_v29 = vadd.f32 %v1680_v12, %v1667_v26 }
 0x18a   :  { %v1682_v27 = vpop.f32.mrf.mxu1 }
 0x18b   :  { %v1683_v31 = vadd.f32 %v1682_v27, %v1669_v28 }
 0x198   :  { %v1638_v59 = vpop.f32.mrf.mxu2 }
 0x199   :  { %v1639_v8 = vadd.f32 %v1638_v59, %v1625_v6 }
 0x1a0   :  { %v1640_v2 = vpop.f32.mrf.mxu2 }
 0x1a1   :  { %v1641_v10 = vadd.f32 %v1640_v2, %v1627_v7 }
 0x1a8   :  { %v1694_v15 = vpop.f32.mrf.mxu2 }
 0x1a9   :  { %v1695_v32 = vadd.f32 %v1694_v15, %v1681_v29 }
 0x1b0   :  { %v1696_v30 = vpop.f32.mrf.mxu2 }
 0x1b1   :  { %v1697_v33 = vadd.f32 %v1696_v30, %v1683_v31 }
 0x1b7   :  { %v1652_v3 = vpop.f32.mrf.mxu3 }
 0x1b8   :  { %v1653_v11 = vadd.f32 %v1652_v3, %v1639_v8 }
 0x1ba   :  { %v1713_v19 = vmax.f32 %v1653_v11, 0.0 }
 0x1bf   :  { %v1654_v13 = vpop.f32.mrf.mxu3 }
 0x1c0   :  { %v1655_v14 = vadd.f32 %v1654_v13, %v1641_v10 }
 0x1c2   :  { %v1715_v20 = vmax.f32 %v1655_v14, 0.0 }
 0x1c4   :  { %v1717_v23 = vpack.c.bf16 %v1715_v20, %v1713_v19 }
 0x1c6   :  { %1859 = vmatmul.bf16.vlgmr.msra.gmra.mxu0 %v1717_v23 }
 0x1c7   :  { %v1708_v25 = vpop.f32.mrf.mxu3 }
 0x1c8   :  { %v1709_v34 = vadd.f32 %v1708_v25, %v1695_v32 }
 0x1ca   :  { %v1714_v37 = vmax.f32 %v1709_v34, 0.0 }
 0x1cf   :  { %v1710_v35 = vpop.f32.mrf.mxu3 }
 0x1d0   :  { %v1711_v36 = vadd.f32 %v1710_v35, %v1697_v33 }
 0x1d2   :  { %v1716_v38 = vmax.f32 %v1711_v36, 0.0 }
 0x1d4   :  { %v1718_v39 = vpack.c.bf16 %v1716_v38, %v1714_v37 }
 0x1d6   :  { %1873 = vmatmul.bf16.vlgmr.msra.gmra.mxu1 %v1718_v39 }
 0x243   :  { %v1860_v40 = vpop.f32.mrf.mxu0 }
 0x244   :  { %v1861_v42 = vadd.f32 %v2956_v41, %v1860_v40 }
 0x24b   :  { %v1862_v44 = vpop.f32.mrf.mxu0 }
 0x24c   :  { %v1863_v45 = vadd.f32 %v2956_v41, %v1862_v44 }
 0x253   :  { %v1874_v43 = vpop.f32.mrf.mxu1 }
 0x254   :  { %v1875_v21 = vadd.f32 %v1874_v43, %v1861_v42 }
 0x256   :  { %1879 = vst [vmem:[#allocation12] sm:$0xff] %v1875_v21 }
 0x25b   :  { %v1876_v46 = vpop.f32.mrf.mxu1 }
 0x25c   :  { %v1877_v16 = vadd.f32 %v1876_v46, %v1863_v45 }
 0x25e   :  { %1880 = vst [vmem:[#allocation12 + $0x8] sm:$0xff] %v1877_v16 }
 0x25f   :  { %1884 = vsyncadd [#allocation5], 224  ;;  %s1887_s9 = sshll.u32 %s3224_s7, 4  ;;  %s3120_s10 = smov [#allocation12]   ;;  %s1888_s9 = int_to_ptr.hbm [resolvable:$true] %s1887_s9 }
 0x260   :  { %s1885_s11 = sshll.u32 %s3120_s10, 4  ;;  %s3121_s12 = smov 32   ;;  %s1886_s11 = int_to_ptr.vmem [resolvable:$true] %s1885_s11 }
 0x261   :  { %s3122_s6 = smov 2  }
 0x262   :  { %1893 = dma.vmem_to_hbm [thread:$0]  %s1886_s11, 32, %s1888_s9, [#allocation5], %s3121_s12, %s3121_s12, %s3122_s6  }
 0x263   :  { %3107 = dma.done.wait [#allocation5], 256  }
 0x264   :  { %3108 = vsyncadd [#allocation5], 4294967040 }
 0x265   :  { %1898 = vsyncpa [#allocation4], 1 }
 0x266   :  { %1899 = vsyncpa [#allocation7], 1 }
 0x267   :  { %1900 = vsyncpa [#allocation10], 1 }
 0x268   :  { %1901 = vsyncpa [#allocation5], 1 }

</bundles_post_ra>
